<compile_context>
chip_gen: v7x
topology: tpu7x:2x2x1
jax: 0.10.0
libtpu: 0.0.40
codegen_flags: <defaults>
</compile_context>

<pallas_src>
import math

import jax
import jax.numpy as jnp
from jax.experimental import pallas as pl
from jax.experimental.pallas import tpu as pltpu

LOG2 = math.log(2.0)


def _shifted_softplus(x):
    # softplus(x) - log(2), numerically stable
    return jnp.maximum(x, 0.0) + jnp.log1p(jnp.exp(-jnp.abs(x))) - LOG2


def atomwise_kernel(rep_ref, w1_ref, b1_ref, w2_ref, y0_ref, yi_ref):
    """One block of Bb molecules per grid step (n_out == 1 specialization).

    rep_ref : (Bb*A, n_in)  bf16  atom-wise representation block (pre-flattened)
    w1_ref  : (n_in, H)     bf16  hidden layer weight (H = n_in // 2)
    b1_ref  : (1, H)        f32   hidden layer bias
    w2_ref  : (1, H)        f32   output layer weight row, pre-scaled by stddev
    y0_ref  : (1, Bb, A)    f32   atomref[Z] + b2*stddev + mean (lane-dense)
    yi_ref  : (1, Bb, A)    f32   atom-wise contributions (lane-dense output)
    """
    bb, a_pad = y0_ref.shape[1], y0_ref.shape[2]
    h_dim = w1_ref.shape[1]

    # Layer 1: bf16 MXU matmul with f32 accumulate, then shifted_softplus (EUP).
    h = jnp.dot(rep_ref[...], w1_ref[...], preferred_element_type=jnp.float32)
    h = _shifted_softplus(h + b1_ref[...])                      # (Bb*A, H) f32

    # Layer 2 (n_out == 1): VPU multiply + lane-axis reduce instead of an MXU
    # pass with a single output column. ScaleShift's stddev is already folded
    # into w2; bias + mean + atomref are folded into y0.
    hw = h * w2_ref[...]                                        # (Bb*A, H)
    # Splitting the leading dim on an 8-multiple boundary (A_pad % 8 == 0) is
    # layout-preserving -- no VMEM copy is materialized.
    yi = jnp.sum(hw.reshape(bb, a_pad, h_dim), axis=-1)         # (Bb, A)
    yi_ref[0] = (yi + y0_ref[0]).astype(yi_ref.dtype)


def _vmem_capacity_bytes():
    """Detected per-core VMEM capacity; conservative fallback if unavailable."""
    try:
        return int(pltpu.get_tpu_info().vmem_capacity_bytes)
    except Exception:
        return 64 << 20  # v7x-sized fallback (smallest of the three generations)


def _choose_blocks(B, A, n_in, rep_itemsize, *, target_block_bytes=3 << 20,
                   max_block_bytes=4 << 20, min_steps=4):
    """Pick Bb (molecules per grid step) by bytes, with padding for odd sizes.

    Returns (Bb, grid, B_pad, A_pad).
      * per-step rep DMA targets ~target_block_bytes (HBM-roofline friendly),
      * at least `min_steps` grid steps so each v7x TensorCore keeps >= 2
        blocks in flight after the parallel-axis split,
      * A padded to a multiple of 8 (sublane) so the in-kernel split reshape
        stays copy-free; B padded to grid*Bb.
    """
    a_pad = -(-A // 8) * 8
    bytes_per_mol = a_pad * n_in * rep_itemsize
    bb = max(1, min(target_block_bytes // bytes_per_mol, B))
    bb = min(bb, max(1, -(-B // min_steps)))          # keep >= min_steps steps
    while bb > 1 and bb * bytes_per_mol > max_block_bytes:
        bb -= 1
    grid = -(-B // bb)
    return int(bb), int(grid), int(grid * bb), int(a_pad)


def _vmem_limit_bytes(bb, a_pad, n_in, h_dim, rep_itemsize):
    """Explicit scoped-VMEM budget: 2x rep + 2x(y0+yi) + weights + h/hw + slack."""
    rep_blk = bb * a_pad * n_in * rep_itemsize
    io_blk = bb * a_pad * 4
    w_bytes = n_in * h_dim * rep_itemsize + 2 * h_dim * 4
    interm = 2 * bb * a_pad * h_dim * 4               # h and hw in f32
    need = 2 * rep_blk + 4 * io_blk + 2 * w_bytes + interm + (2 << 20)
    cap = _vmem_capacity_bytes()
    return int(min(max(need, 32 << 20), int(cap * 0.75)))


def atomwise_forward(representation, atomic_numbers, atom_mask, params,
                     mean=0.0, stddev=1.0, aggregation_mode="sum",
                     return_contributions=True):
    """Pallas implementation of Atomwise.forward (n_out == 1)."""
    B, A, n_in = representation.shape
    w1, b1, w2, b2, atomref_table = params
    H = w1.shape[1]
    n_out = w2.shape[1]
    if n_out != 1:
        # TODO(synk): general n_out > 1 would use an MXU layer-2 matmul with a
        # (B, A, n_out) output layout; this kernel specializes the module
        # default n_out=1 to keep the yi store lane-dense.
        raise NotImplementedError("Pallas Atomwise kernel specializes n_out == 1")
    if aggregation_mode not in ("sum", "avg"):
        raise ValueError(f"Invalid aggregation_mode={aggregation_mode}!")

    f32 = jnp.float32
    bf16 = jnp.bfloat16

    # Kernel inputs: representation + w1 in bf16 (halves the dominant HBM read;
    # no f32 copy of the representation is materialized if it arrives as bf16).
    rep = representation.astype(bf16)
    w1_b = w1.astype(bf16)
    b1_r = b1.reshape(1, H).astype(f32)

    # Fold ScaleShift into layer-2 params (done once, outside the kernel).
    w2_row = (w2[:, 0].astype(f32) * stddev).reshape(1, H)          # (1, H)
    shift = jnp.asarray(b2, f32).reshape(-1)[0] * stddev + mean     # scalar

    # Glue: atomref embedding lookup (gather) + fold bias/shift; lane-dense (B, A).
    if atomref_table is not None:
        y0 = jnp.take(atomref_table[:, 0].astype(f32), atomic_numbers, axis=0)
    else:
        y0 = jnp.zeros((B, A), f32)
    y0 = (y0 + shift).astype(f32)

    Bb, G, B_pad, A_pad = _choose_blocks(B, A, n_in, jnp.dtype(bf16).itemsize)

    if B_pad != B or A_pad != A:
        rep = jnp.pad(rep, ((0, B_pad - B), (0, A_pad - A), (0, 0)))
        y0 = jnp.pad(y0, ((0, B_pad - B), (0, A_pad - A)))

    # Leading-dim collapse in the wrapper (free) -- no in-kernel input reshape.
    rep_flat = rep.reshape(B_pad * A_pad, n_in)
    # Group the batch axis so every block's last-two dims equal the full array
    # dims (keeps the (8, 128) BlockSpec rule satisfied for lane-dense blocks).
    y0_g = y0.reshape(G, Bb, A_pad)

    yi_g = pl.pallas_call(
        atomwise_kernel,
        out_shape=jax.ShapeDtypeStruct((G, Bb, A_pad), f32),
        grid_spec=pltpu.PrefetchScalarGridSpec(
            num_scalar_prefetch=0,
            grid=(G,),
            in_specs=[
                pl.BlockSpec((Bb * A_pad, n_in), lambda i: (i, 0)),   # representation (flat)
                pl.BlockSpec((n_in, H), lambda i: (0, 0)),            # w1 (bf16)
                pl.BlockSpec((1, H), lambda i: (0, 0)),               # b1
                pl.BlockSpec((1, H), lambda i: (0, 0)),               # w2 * stddev
                pl.BlockSpec((1, Bb, A_pad), lambda i: (i, 0, 0)),    # y0 (folded)
            ],
            out_specs=pl.BlockSpec((1, Bb, A_pad), lambda i: (i, 0, 0)),  # yi
        ),
        compiler_params=pltpu.CompilerParams(
            dimension_semantics=("parallel",),
            vmem_limit_bytes=_vmem_limit_bytes(Bb, A_pad, n_in, H,
                                               jnp.dtype(bf16).itemsize)),
    )(rep_flat, w1_b, b1_r, w2_row, y0_g)

    yi2d = yi_g.reshape(B_pad, A_pad)[:B, :A]                        # (B, A)

    # Aggregate(axis=1): masked sum over atoms, computed in the wrapper (the
    # tiny (B, 1) result fuses against the yi read for free in XLA).
    mask = atom_mask.astype(f32)
    y = jnp.sum(yi2d * mask, axis=1, keepdims=True)                  # (B, 1)
    if aggregation_mode == "avg":
        y = y / jnp.maximum(jnp.sum(mask, axis=1, keepdims=True), 1.0)

    result = {"y": y}
    if return_contributions:
        result["yi"] = yi2d[..., None]                               # (B, A, 1)
    return result


def _reference_forward(representation, atomic_numbers, atom_mask, params,
                       mean, stddev, aggregation_mode="sum"):
    """Pure-JAX reference of the PyTorch forward semantics (f32)."""
    w1, b1, w2, b2, atomref_table = params
    h = _shifted_softplus(representation @ w1 + b1)
    yi = h @ w2 + b2
    yi = yi * stddev + mean
    if atomref_table is not None:
        yi = yi + jnp.take(atomref_table, atomic_numbers, axis=0)
    y = jnp.sum(yi * atom_mask[..., None], axis=1)
    if aggregation_mode == "avg":
        y = y / jnp.maximum(jnp.sum(atom_mask, axis=1, keepdims=True), 1.0)
    return {"y": y, "yi": yi}


if __name__ == "__main__":
    # Module hyperparameters (pyramidal MLP: n_in -> n_in//2 -> n_out)
    n_in, n_out, max_z = 128, 1, 100
    H = n_in // 2
    B, A = 8, 128  # 8 molecules, 128 atom slots each (A lane-dense)

    key = jax.random.PRNGKey(0)
    k = iter(jax.random.split(key, 8))

    # Deterministic parameter init (synthetic, not a checkpoint load)
    w1 = jax.random.normal(next(k), (n_in, H), jnp.float32) * (1.0 / math.sqrt(n_in))
    b1 = jax.random.normal(next(k), (1, H), jnp.float32) * 0.1
    w2 = jax.random.normal(next(k), (H, n_out), jnp.float32) * (1.0 / math.sqrt(H))
    b2 = jax.random.normal(next(k), (1, n_out), jnp.float32) * 0.1
    atomref_table = jax.random.normal(next(k), (max_z, n_out), jnp.float32) * 0.05
    atomref_table = atomref_table.at[0].set(0.0)  # reference for "mask" atoms is 0
    params = (w1, b1, w2, b2, atomref_table)

    # ScaleShift statistics (property mean / stddev)
    mean, stddev = 0.25, 1.5

    # Inputs -- representation produced directly in bf16 (no f32 HBM copy).
    representation = jax.random.normal(next(k), (B, A, n_in), jnp.float32).astype(jnp.bfloat16)
    atomic_numbers = jax.random.randint(next(k), (B, A), 1, max_z, jnp.int32)
    atom_mask = jnp.ones((B, A), jnp.float32)
    atom_mask = atom_mask.at[1, 100:].set(0.0)    # molecule 1 has 100 real atoms
    atom_mask = atom_mask.at[5, 77:].set(0.0)     # molecule 5 has 77 real atoms
    atomic_numbers = atomic_numbers * atom_mask.astype(jnp.int32)  # Z=0 for padding

    out = atomwise_forward(representation, atomic_numbers, atom_mask, params,
                           mean=mean, stddev=stddev, return_contributions=True)
    jax.block_until_ready(out["y"])
    jax.block_until_ready(out["yi"])

    # Reference in f32, fed the exact bf16-representable values the kernel sees.
    ref_params = (w1.astype(jnp.bfloat16).astype(jnp.float32), b1, w2, b2, atomref_table)
    ref = _reference_forward(representation.astype(jnp.float32), atomic_numbers,
                             atom_mask, ref_params, mean, stddev)
    assert out["y"].shape == ref["y"].shape
    assert out["yi"].shape == ref["yi"].shape
    assert jnp.allclose(out["y"], ref["y"], atol=5e-2, rtol=5e-3)
    assert jnp.allclose(out["yi"], ref["yi"], atol=5e-3, rtol=5e-3)

    print("KERNEL_OK")
</pallas_src>

<mosaic_0001>
module attributes {stable_mosaic.version = 11 : i64} {
  func.func @atomwise_kernel(%arg0: i32, %arg1: memref<256x128xbf16, #tpu.memory_space<vmem>>, %arg2: memref<128x64xbf16, #tpu.memory_space<vmem>>, %arg3: memref<1x64xf32, #tpu.memory_space<vmem>>, %arg4: memref<1x64xf32, #tpu.memory_space<vmem>>, %arg5: memref<1x2x128xf32, #tpu.memory_space<vmem>>, %arg6: memref<1x2x128xf32, #tpu.memory_space<vmem>>) attributes {dimension_semantics = [#tpu.dimension_semantics<parallel>], iteration_bounds = array<i64: 4>, scalar_prefetch = 0 : i64, scratch_operands = 0 : i64, tpu.core_type = #tpu.core_type<tc>, window_params = [{transform_indices = @transform_0, window_bounds = array<i64: 256, 128>}, {pipeline_mode = #tpu.pipeline_mode<synchronous>, transform_indices = @transform_1, window_bounds = array<i64: 128, 64>}, {pipeline_mode = #tpu.pipeline_mode<synchronous>, transform_indices = @transform_2, window_bounds = array<i64: 1, 64>}, {pipeline_mode = #tpu.pipeline_mode<synchronous>, transform_indices = @transform_3, window_bounds = array<i64: 1, 64>}, {transform_indices = @transform_4, window_bounds = array<i64: 1, 2, 128>}, {transform_indices = @transform_5, window_bounds = array<i64: 1, 2, 128>}]} {
    %c0 = arith.constant 0 : index
    %c0_0 = arith.constant 0 : index
    %0 = vector.load %arg1[%c0, %c0_0] : memref<256x128xbf16, #tpu.memory_space<vmem>>, vector<256x128xbf16>
    %c0_1 = arith.constant 0 : index
    %c0_2 = arith.constant 0 : index
    %1 = vector.load %arg2[%c0_1, %c0_2] : memref<128x64xbf16, #tpu.memory_space<vmem>>, vector<128x64xbf16>
    %cst = arith.constant dense<0.000000e+00> : vector<256x64xf32>
    %2 = tpu.matmul %0, %1, %cst {dimension_numbers = #tpu.dot_dimension_numbers<[1], [0], [0], [1], [0, 0, 1, 1], [], []>} : vector<256x128xbf16>, vector<128x64xbf16>, vector<256x64xf32> -> vector<256x64xf32>
    %c0_3 = arith.constant 0 : index
    %c0_4 = arith.constant 0 : index
    %3 = vector.load %arg3[%c0_3, %c0_4] : memref<1x64xf32, #tpu.memory_space<vmem>>, vector<1x64xf32>
    %4 = vector.broadcast %3 : vector<1x64xf32> to vector<256x64xf32>
    %5 = arith.addf %2, %4 : vector<256x64xf32>
    %cst_5 = arith.constant 0.000000e+00 : f32
    %6 = vector.broadcast %cst_5 : f32 to vector<256x64xf32>
    %7 = arith.maximumf %5, %6 : vector<256x64xf32>
    %8 = math.absf %5 : vector<256x64xf32>
    %cst_6 = arith.constant 0.000000e+00 : f32
    %9 = vector.broadcast %cst_6 : f32 to vector<256x64xf32>
    %10 = arith.subf %9, %8 : vector<256x64xf32>
    %11 = math.exp %10 : vector<256x64xf32>
    %12 = math.log1p %11 : vector<256x64xf32>
    %13 = arith.addf %7, %12 : vector<256x64xf32>
    %cst_7 = arith.constant 0.693147182 : f32
    %14 = vector.broadcast %cst_7 : f32 to vector<256x64xf32>
    %15 = arith.subf %13, %14 : vector<256x64xf32>
    %c0_8 = arith.constant 0 : index
    %c0_9 = arith.constant 0 : index
    %16 = vector.load %arg4[%c0_8, %c0_9] : memref<1x64xf32, #tpu.memory_space<vmem>>, vector<1x64xf32>
    %17 = vector.broadcast %16 : vector<1x64xf32> to vector<256x64xf32>
    %18 = arith.mulf %15, %17 : vector<256x64xf32>
    %19 = vector.shape_cast %18 : vector<256x64xf32> to vector<2x128x64xf32>
    %cst_10 = arith.constant dense<0.000000e+00> : vector<2x128xf32>
    %20 = vector.multi_reduction <add>, %19, %cst_10 [2] : vector<2x128x64xf32> to vector<2x128xf32>
    %c0_11 = arith.constant 0 : index
    %c0_12 = arith.constant 0 : index
    %c0_13 = arith.constant 0 : index
    %21 = vector.load %arg5[%c0_11, %c0_12, %c0_13] : memref<1x2x128xf32, #tpu.memory_space<vmem>>, vector<1x2x128xf32>
    %22 = vector.shape_cast %21 : vector<1x2x128xf32> to vector<2x128xf32>
    %23 = arith.addf %20, %22 : vector<2x128xf32>
    %c0_14 = arith.constant 0 : index
    %c0_15 = arith.constant 0 : index
    %c0_16 = arith.constant 0 : index
    %24 = vector.load %arg6[%c0_14, %c0_15, %c0_16] : memref<1x2x128xf32, #tpu.memory_space<vmem>>, vector<1x2x128xf32>
    %25 = vector.shape_cast %24 : vector<1x2x128xf32> to vector<2x128xf32>
    %26 = vector.shape_cast %23 : vector<2x128xf32> to vector<1x2x128xf32>
    tpu.vector_store %arg6[%c0_14, %c0_15, %c0_16], %26 {strides = array<i32>} : memref<1x2x128xf32, #tpu.memory_space<vmem>>, vector<1x2x128xf32>,
    return
  }
  func.func @transform_0(%arg0: i32) -> (i32, i32) {
    %c0_i32 = arith.constant 0 : i32
    %c0_i32_0 = arith.constant 0 : i32
    return %arg0, %c0_i32 : i32, i32
  }
  func.func @transform_1(%arg0: i32) -> (i32, i32) {
    %c0_i32 = arith.constant 0 : i32
    %c0_i32_0 = arith.constant 0 : i32
    %c0_i32_1 = arith.constant 0 : i32
    return %c0_i32, %c0_i32_0 : i32, i32
  }
  func.func @transform_2(%arg0: i32) -> (i32, i32) {
    %c0_i32 = arith.constant 0 : i32
    %c0_i32_0 = arith.constant 0 : i32
    %c0_i32_1 = arith.constant 0 : i32
    return %c0_i32, %c0_i32_0 : i32, i32
  }
  func.func @transform_3(%arg0: i32) -> (i32, i32) {
    %c0_i32 = arith.constant 0 : i32
    %c0_i32_0 = arith.constant 0 : i32
    %c0_i32_1 = arith.constant 0 : i32
    return %c0_i32, %c0_i32_0 : i32, i32
  }
  func.func @transform_4(%arg0: i32) -> (i32, i32, i32) {
    %c0_i32 = arith.constant 0 : i32
    %c0_i32_0 = arith.constant 0 : i32
    %c0_i32_1 = arith.constant 0 : i32
    return %arg0, %c0_i32, %c0_i32_0 : i32, i32, i32
  }
  func.func @transform_5(%arg0: i32) -> (i32, i32, i32) {
    %c0_i32 = arith.constant 0 : i32
    %c0_i32_0 = arith.constant 0 : i32
    %c0_i32_1 = arith.constant 0 : i32
    return %arg0, %c0_i32, %c0_i32_0 : i32, i32, i32
  }
}

</mosaic_0001>

<bundles_post_ra>
// kernel: tpu_custom_call.1
= control target key start
LH: loop header
LB: loop body
LE: loop exit
PB: predicated region body
PF: predicated region fallthrough
CT: control target
= control target key end

     0   :  { %10 = vsyncpa [#allocation3], 0  ;;  %s3581_s0 = inlined_call_operand.hbm [shape: bf16[1024,128], index: 0, kind: input, shape index: {}]   ;;  %s3582_s1 = inlined_call_operand.vmem [shape: bf16[128,64], index: 1, kind: input, shape index: {}]   ;;  %s3583_s2 = inlined_call_operand.vmem [shape: f32[1,64], index: 2, kind: input, shape index: {}]   ;;  %s3584_s3 = inlined_call_operand.vmem [shape: f32[1,64], index: 3, kind: input, shape index: {}]   ;;  %s3585_s4 = inlined_call_operand.vmem [shape: f32[4,2,128], index: 4, kind: input, shape index: {}]   ;;  %s3586_s5 = inlined_call_operand.hbm [shape: f32[4,2,128], index: 5, kind: output, shape index: {}]  }
   0x1   :  { %12 = vsyncpa [#allocation3 + $0x1], 0 }
   0x2   :  { %13 = vsyncpa [#allocation4], 0 }
   0x3   :  { %15 = vsyncpa [#allocation4 + $0x1], 0  ;;  %s2385_s18 = smov 0   ;;  %s2387_s19 = smov 0  }
   0x4   :  { %s2389_s20 = smov 0   ;;  %s2391_s21 = smov 0  }
   0x5 LB: > { %s2406_s22 = sadd.s32 4294967295, %s2348_s21   ;;  %s1888_s23 = sadd.s32 4294967294, %s2348_s21   ;;  %s2348_s21 = sphi %s2391_s21, %s3707_s21   ;;  %s2344_s20 = sphi %s2389_s20, %s3706_s20   ;;  %s2340_s19 = sphi %s2387_s19, %s3705_s19   ;;  %s2336_s18 = sphi %s2385_s18, %s3704_s18  }
   0x6   : > { %s2410_s24 = sadd.s32 1, %s2348_s21   ;;  %s28_s25 = sadd.s32 1, %s2344_s20 }
   0x7   : > { %s25_s26 = ssub.s32 %s2348_s21, %s2410_s24  ;;  %p35_p0 = scmp.ne.s32.totalorder %s2344_s20, %s2340_s19 }
   0x8   : > { %p26_p1 = scmp.eq.s32.totalorder %s25_s26, 0  ;;  %p36_p2 = scmp.eq.s32.totalorder %s2348_s21, 0 }
   0x9   : > { %p41_p3 = scmp.ne.s32.totalorder %s2340_s19, %s2336_s18  ;;  %p42_p4 = scmp.eq.s32.totalorder %s2406_s22, 0 }
   0xa   : > { %s2422_s27 = scalar_select %p26_p1, %s2344_s20, %s28_s25  }
   0xb   : > { %p2424_p5 = por %p36_p2, %p35_p0  ;;  %p2428_p6 = por %p42_p4, %p41_p3 }
   0xc   : > { %p154_p7 = scmp.eq.s32.totalorder %s2406_s22, 3  ;;  %p160_p8 = scmp.eq.s32.totalorder %s1888_s23, 3 }
   0xd   : > { %p2061_p9 = scmp.lt.s32.totalorder %s2348_s21, 4  ;;  %s189_s7 = sand.u32 1, %s2344_s20  }
   0xe   : > { %p2434_p10 = por %p154_p7, %p35_p0  ;;  %p2438_p11 = por %p160_p8, %p41_p3 }
   0xf   : > { %s1960_s8 = sshll.u32 %s2348_s21, 11  ;;  %s1891_s9 = sshll.u32 %s189_s7, 7 }
  0x10   : > { %s3594_s30 = scalar_select %p2434_p10, 1, 0 }
  0x11   : > { %s3595_s6 = scalar_select %p2438_p11, 1, 0 }
  0x12   : > { %s2447_s12 = scalar_lea.hbm %s3581_s0, %s1960_s8  ;;  %s193_s13 = scalar_lea.vmem [#allocation2], %s1891_s9 }
  0x13   : > { %s200_s14 = sshll.u32 %s193_s13, 4  ;;  %p2451_p12 = pnand %p2061_p9, %p2424_p5  ;;  %s2455_s14 = int_to_ptr.vmem [resolvable:$true] %s200_s14 }
  0x14   : > { %s2457_s16 = scalar_lea.sflag [#allocation3], %s189_s7  ;;  %s2252_s17 = scalar_lea.hbm %s2447_s12, 2048 }
  0x15   : > { %p2253_p13 = scmp.ne.s32.totalorder %s2447_s12, %s2252_s17  ;;  %p2254_p0 = pneg %p2451_p12 }
  0x16   : > { %s2257_s26 = scalar_lea.hbm %s3581_s0, 8192  ;;  %p2258_p3 = scmp.lt.u32.totalorder %s2447_s12, %s3581_s0 }
  0x17   : > { %p2255_p1 = pnand %p2254_p0, %p2253_p13  ;;  %p2259_p4 = scmp.lt.u32.totalorder %s2257_s26, %s2252_s17 }
  0x18   : > { %p2261_p7 = scmp.lt.u32.totalorder %s2252_s17, %s2447_s12 }
  0x19   : > { %p2256_p2 = pneg %p2255_p1  ;;  %p2260_p5 = por %p2259_p4, %p2258_p3 }
  0x1b   : > { %p2262_p8 = por %p2261_p7, %p2260_p5 }
  0x1d   : > { %p2263_p9 = pnand %p2262_p8, %p2256_p2 }
  0x1f   : > { %2266 = shalt.err (!%p2263_p9)
}
  0x20   : > { %s2267_s7 = scalar_lea.vmem %s2455_s14, 2048  ;;  %s2350_s9 = smov [#allocation2]  }
  0x21   : > { %p2268_p13 = scmp.ne.s32.totalorder %s2455_s14, %s2267_s7  ;;  %s2272_s10 = sshll.u32 %s2350_s9, 4  ;;  %s2273_s10 = int_to_ptr.vmem [resolvable:$false] %s2272_s10 }
  0x22   : > { %s2274_s11 = scalar_lea.vmem %s2273_s10, 4096  ;;  %p2275_p10 = scmp.lt.s32.totalorder %s2455_s14, %s2273_s10 }
  0x23   : > { %p2270_p1 = pnand %p2268_p13, %p2254_p0  ;;  %p2276_p3 = scmp.lt.s32.totalorder %s2274_s11, %s2267_s7 }
  0x25   : > { %p2271_p11 = pneg %p2270_p1  ;;  %p2277_p4 = por %p2276_p3, %p2275_p10 }
  0x27   : > { %p2278_p5 = pnand %p2277_p4, %p2271_p11 }
  0x29   : > { %2281 = shalt.err (!%p2278_p5)
}
  0x2a   : > { %s2351_s13 = smov 64   ;;  %s2352_s17 = smov 4  }
  0x2b   : > { %2056 = dma.hbm_to_vmem [thread:$0]  (!%p2451_p12), %s2447_s12, 2048, %s2455_s14, %s2457_s16, %s2351_s13, %s2351_s13, %s2352_s17  }
  0x2c   : > { %p1894_p0 = scmp.ge.s32.totalorder %s2348_s21, 1  ;;  %p215_p2 = scmp.lt.s32.totalorder %s2348_s21, 5 }
  0x2e   : > { %p216_p7 = pnand %p1894_p0, %p215_p2 }
  0x30   : > { %219 = sbr.rel (%p216_p7) target bundleno = 772 (0x304), region = 40 }
  0x37   : > { %s2488_s23 = sand.u32 1, %s2340_s19  }
  0x38   : > { %s1895_s25 = sshll.u32 %s2488_s23, 7  ;;  %s222_s26 = scalar_lea.sflag [#allocation3], %s2488_s23 }
  0x39   : > { %s2492_s28 = scalar_lea.vmem [#allocation2], %s1895_s25 }
  0x3a   : > { %2327 = dma.done.wait (%p2428_p6), %s222_s26, 2048  }
  0x3b   : > { %2329 = vsyncadd (%p2428_p6), %s222_s26, 4294965248  ;;  %v2100_v0 = vld [vmem:[%s3582_s1] sm:$0xff]   ;;  %v2101_v1 = vld [vmem:[%s3582_s1 + $0x8] sm:$0xff]   ;;  %p257_p6 = scmp.lt.s32.totalorder %s2406_s22, 3  ;;  %v3588_v7 = vlaneseq  ;;  %s1957_s17 = sshll.u32 %s2406_s22, 5 }
  0x3c   : > { %1985 = vmatprep.subr.bf16.mxu0 %v2100_v0  ;;  %2033 = vmatprep.subr.bf16.mxu1 %v2100_v0  ;;  %v2102_v2 = vld [vmem:[%s3582_s1 + $0x10] sm:$0xff]   ;;  %v2103_v3 = vld [vmem:[%s3582_s1 + $0x18] sm:$0xff]   ;;  %v2108_v4 = vld [vmem:[%s2492_s28] sm:$0xff]   ;;  %s3538_s15 = scalar_lea.hbm %s3586_s5, %s1957_s17  ;;  %p3702_p11 = scmp.ne.s32.totalorder %s3594_s30, 0 }
  0x3d   : > { %1986 = vmatpush3.bf16.msra.mxu0 %v2100_v0  ;;  %2041 = vmatpush3.bf16.msra.mxu1 %v2100_v0  ;;  %v2109_v5 = vld [vmem:[%s2492_s28 + $0x40] sm:$0xff]   ;;  %s258_s13 = scalar_select %p257_p6, %s2406_s22, 3  ;;  %v2105_v8 = vld [vmem:[%s3582_s1 + $0x28] sm:$0xff]   ;;  %v2521_v9 = vshrl.u32 %v3588_v7, 7  ;;  %v2106_v10 = vld [vmem:[%s3582_s1 + $0x30] sm:$0xff]  }
  0x3e   : > { %1987 = vmatprep.subr.bf16.mxu0 %v2101_v1  ;;  %2034 = vmatprep.subr.bf16.mxu1 %v2101_v1  ;;  %v2104_v6 = vld [vmem:[%s3582_s1 + $0x20] sm:$0xff]   ;;  %v2107_v12 = vld [vmem:[%s3582_s1 + $0x38] sm:$0xff]   ;;  %v2110_v15 = vld [vmem:[%s2492_s28 + $0x8] sm:$0xff]   ;;  %s1793_s22 = scalar_lea.sflag [#allocation4], %s2488_s23 }
  0x3f   : > { %2001 = vmatprep.mubr.bf16.mxu0 %v2108_v4  ;;  %2017 = vmatprep.mubr.bf16.mxu1 %v2109_v5  ;;  %3597 = vst [vmem:[#allocation8_spill] sm:$0xff] %v2521_v9  ;;  %s1897_s26 = sshll.u32 %s258_s13, 1  ;;  %v1274_v11 = vsub.s32 0, %v2521_v9  ;;  %v2111_v16 = vld [vmem:[%s2492_s28 + $0x48] sm:$0xff]   ;;  %v2112_v17 = vld [vmem:[%s2492_s28 + $0x10] sm:$0xff]   ;;  %v2114_v19 = vld [vmem:[%s2492_s28 + $0x18] sm:$0xff]  }
  0x40   : > { %s260_s8 = scalar_lea.vmem %s3585_s4, %s1897_s26  ;;  %v2113_v18 = vld [vmem:[%s2492_s28 + $0x50] sm:$0xff]   ;;  %v2115_v20 = vld [vmem:[%s2492_s28 + $0x58] sm:$0xff]   ;;  %v2116_v21 = vld [vmem:[%s2492_s28 + $0x20] sm:$0xff]   ;;  %v1341_v27 = vsub.s32 1, %v2521_v9  ;;  %s1896_s13 = sshll.u32 %s2488_s23, 1 }
  0x41   : > { %1988 = vmatpush3.bf16.msra.mxu0 %v2101_v1  ;;  %2042 = vmatpush3.bf16.msra.mxu1 %v2101_v1  ;;  %v1270_v13 = vld [vmem:[%s260_s8] sm:$0x3]  ;;  %v2118_v23 = vld [vmem:[%s2492_s28 + $0x28] sm:$0xff]   ;;  %v2120_v25 = vld [vmem:[%s2492_s28 + $0x30] sm:$0xff]   ;;  %s255_s25 = scalar_lea.vmem [#allocation5], %s1896_s13  ;;  %s2354_s8 = smov [#allocation5]  }
  0x42   : > { %1989 = vmatprep.subr.bf16.mxu0 %v2102_v2  ;;  %2035 = vmatprep.subr.bf16.mxu1 %v2102_v2  ;;  %v1275_v14 = vrot.slane %v1270_v13, %v1274_v11  ;;  %v2117_v22 = vld [vmem:[%s2492_s28 + $0x60] sm:$0xff]   ;;  %v2119_v24 = vld [vmem:[%s2492_s28 + $0x68] sm:$0xff]   ;;  %v2121_v26 = vld [vmem:[%s2492_s28 + $0x70] sm:$0xff]   ;;  %v1342_v30 = vrot.slane %v1270_v13, %v1341_v27  ;;  %s1806_s26 = sshll.u32 %s255_s25, 4  ;;  %s2286_s29 = sshll.u32 %s2354_s8, 4  ;;  %s3540_s26 = int_to_ptr.vmem [resolvable:$true] %s1806_s26  ;;  %s2287_s29 = int_to_ptr.vmem [resolvable:$false] %s2286_s29 }
  0x43   : > { %v2122_v28 = vld [vmem:[%s2492_s28 + $0x38] sm:$0xff]   ;;  %v2551_v37 = vld [vmem:[%s3583_s2] ss:$0 sm:$0xff]  ;;  %s2282_s16 = scalar_lea.vmem %s3540_s26, 32  ;;  %s2288_s7 = scalar_lea.vmem %s2287_s29, 64 }
  0x44   : > { %1281 = vbcast.lane.b32.xlu1 %v1275_v14, 264  ;;  %1277 = vbcast.lane.b32.xlu0 %v1275_v14, 256  ;;  %v2123_v29 = vld [vmem:[%s2492_s28 + $0x78] sm:$0xff]   ;;  %p2283_p10 = scmp.ne.s32.totalorder %s3540_s26, %s2282_s16  ;;  %p2289_p9 = scmp.lt.s32.totalorder %s3540_s26, %s2287_s29 }
  0x45   : > { %1990 = vmatpush3.bf16.msra.mxu0 %v2102_v2  ;;  %2043 = vmatpush3.bf16.msra.mxu1 %v2102_v2  ;;  %p2290_p13 = scmp.lt.s32.totalorder %s2288_s7, %s2282_s16 }
  0x46   : > { %1991 = vmatprep.subr.bf16.mxu0 %v2103_v3  ;;  %2036 = vmatprep.subr.bf16.mxu1 %v2103_v3  ;;  %p2284_p12 = pnand %p2283_p10, %p3702_p11 }
  0x47   : > { %p2291_p1 = por %p2290_p13, %p2289_p9 }
  0x48   : > { %1285 = vbcast.lane.b32.xlu1 %v1275_v14, 272  ;;  %1293 = vbcast.lane.b32.xlu0 %v1275_v14, 288  ;;  %p2285_p8 = pneg %p2284_p12 }
  0x49   : > { %1992 = vmatpush3.bf16.msra.mxu0 %v2103_v3  ;;  %2044 = vmatpush3.bf16.msra.mxu1 %v2103_v3 }
  0x4a   : > { %1993 = vmatprep.subr.bf16.mxu0 %v2104_v6  ;;  %2037 = vmatprep.subr.bf16.mxu1 %v2104_v6  ;;  %p2292_p3 = pnand %p2291_p1, %p2285_p8 }
  0x4c   : > { %1289 = vbcast.lane.b32.xlu1 %v1275_v14, 280  ;;  %1301 = vbcast.lane.b32.xlu0 %v1275_v14, 304 }
  0x4d   : > { %1994 = vmatpush3.bf16.msra.mxu0 %v2104_v6  ;;  %2045 = vmatpush3.bf16.msra.mxu1 %v2104_v6 }
  0x4e   : > { %1995 = vmatprep.subr.bf16.mxu0 %v2105_v8  ;;  %2038 = vmatprep.subr.bf16.mxu1 %v2105_v8 }
  0x50   : > { %1297 = vbcast.lane.b32.xlu1 %v1275_v14, 296  ;;  %1309 = vbcast.lane.b32.xlu0 %v1275_v14, 320 }
  0x51   : > { %1996 = vmatpush3.bf16.msra.mxu0 %v2105_v8  ;;  %2046 = vmatpush3.bf16.msra.mxu1 %v2105_v8 }
  0x52   : > { %1997 = vmatprep.subr.bf16.mxu0 %v2106_v10  ;;  %2039 = vmatprep.subr.bf16.mxu1 %v2106_v10 }
  0x54   : > { %1305 = vbcast.lane.b32.xlu1 %v1275_v14, 312  ;;  %1317 = vbcast.lane.b32.xlu0 %v1275_v14, 336 }
  0x55   : > { %1998 = vmatpush3.bf16.msra.mxu0 %v2106_v10  ;;  %2047 = vmatpush3.bf16.msra.mxu1 %v2106_v10 }
  0x56   : > { %1999 = vmatprep.subr.bf16.mxu0 %v2107_v12  ;;  %2040 = vmatprep.subr.bf16.mxu1 %v2107_v12 }
  0x58   : > { %1313 = vbcast.lane.b32.xlu1 %v1275_v14, 328  ;;  %1325 = vbcast.lane.b32.xlu0 %v1275_v14, 352 }
  0x59   : > { %2000 = vmatpush3.bf16.msra.mxu0 %v2107_v12  ;;  %2048 = vmatpush3.bf16.msra.mxu1 %v2107_v12 }
  0x5c   : > { %2002 = vmatmul.mubr.bf16.vlgmr.msra.gmra.mrb[0].mxu0 %v2110_v15  ;;  %2018 = vmatmul.mubr.bf16.vlgmr.msra.gmra.mrb[0].mxu1 %v2111_v16 }
  0x5d   : > { %2005 = vmatprep.mubr.bf16.mxu0 %v2112_v17  ;;  %2021 = vmatprep.mubr.bf16.mxu1 %v2113_v18 }
  0x5e   : > { %1321 = vbcast.lane.b32.xlu1 %v1275_v14, 344  ;;  %1333 = vbcast.lane.b32.xlu0 %v1275_v14, 368 }
  0x62   : > { %1329 = vbcast.lane.b32.xlu1 %v1275_v14, 360  ;;  %1344 = vbcast.lane.b32.xlu0 %v1342_v30, 256 }
  0x64   : > { %2006 = vmatmul.mubr.bf16.gmra.mrb[4].mxu0 %v2114_v19  ;;  %2022 = vmatmul.mubr.bf16.gmra.mrb[4].mxu1 %v2115_v20 }
  0x65   : > { %2009 = vmatprep.mubr.bf16.mxu0 %v2116_v21  ;;  %2025 = vmatprep.mubr.bf16.mxu1 %v2117_v22 }
  0x66   : > { %1337 = vbcast.lane.b32.xlu1 %v1275_v14, 376  ;;  %1352 = vbcast.lane.b32.xlu0 %v1342_v30, 272 }
  0x6a   : > { %1348 = vbcast.lane.b32.xlu1 %v1342_v30, 264  ;;  %1360 = vbcast.lane.b32.xlu0 %v1342_v30, 288 }
  0x6c   : > { %2010 = vmatmul.mubr.bf16.gmra.mrb[8].mxu0 %v2118_v23  ;;  %2026 = vmatmul.mubr.bf16.gmra.mrb[8].mxu1 %v2119_v24 }
  0x6d   : > { %2013 = vmatprep.mubr.bf16.mxu0 %v2120_v25  ;;  %2029 = vmatprep.mubr.bf16.mxu1 %v2121_v26 }
  0x6e   : > { %1356 = vbcast.lane.b32.xlu1 %v1342_v30, 280  ;;  %1368 = vbcast.lane.b32.xlu0 %v1342_v30, 304 }
  0x72   : > { %1364 = vbcast.lane.b32.xlu1 %v1342_v30, 296  ;;  %1376 = vbcast.lane.b32.xlu0 %v1342_v30, 320 }
  0x74   : > { %2014 = vmatmul.mubr.bf16.gmra.mrb[12].mxu0 %v2122_v28  ;;  %2030 = vmatmul.mubr.bf16.gmra.mrb[12].mxu1 %v2123_v29 }
  0x76   : > { %1372 = vbcast.lane.b32.xlu1 %v1342_v30, 312  ;;  %1384 = vbcast.lane.b32.xlu0 %v1342_v30, 336 }
  0x7a   : > { %1380 = vbcast.lane.b32.xlu1 %v1342_v30, 328  ;;  %1392 = vbcast.lane.b32.xlu0 %v1342_v30, 352 }
  0x7e   : > { %1388 = vbcast.lane.b32.xlu1 %v1342_v30, 344  ;;  %1400 = vbcast.lane.b32.xlu0 %v1342_v30, 368 }
  0x82   : > { %1396 = vbcast.lane.b32.xlu1 %v1342_v30, 360 }
  0x86   : > { %1404 = vbcast.lane.b32.xlu1 %v1342_v30, 376 }
 0x12f   : > { %v2003_v31 = vpop.f32.mrb[0].mxu0  ;;  %v2019_v32 = vpop.f32.mrb[0].mxu1 }
 0x130   : > { %v495_v33 = vpop.f32.mrb[1].mxu0  ;;  %v559_v34 = vpop.f32.mrb[1].mxu1  ;;  %v2554_v40 = vadd.f32 %v2003_v31, %v2551_v37  ;;  %v2557_v41 = vadd.f32 %v2019_v32, %v2551_v37 }
 0x131   : > { %v2004_v35 = vpop.f32.mrb[2].mxu0  ;;  %v2020_v36 = vpop.f32.mrb[2].mxu1  ;;  %v2562_v45 = vadd.f32 %v2551_v37, %v495_v33  ;;  %v2565_v46 = vadd.f32 %v2551_v37, %v559_v34 }
 0x132   : > { %v498_v38 = vpop.f32.mrb[3].mxu0  ;;  %v562_v39 = vpop.f32.mrb[3].mxu1  ;;  %v656_v49 = vand.u32 2147483647, %v2554_v40  ;;  %v672_v52 = vand.u32 2147483647, %v2557_v41  ;;  %v2582_v57 = vadd.f32 %v2004_v35, %v2551_v37  ;;  %v2589_v61 = vadd.f32 %v2020_v36, %v2551_v37 }
 0x133   : > { %v654_v54 = vand.u32 2147483647, %v2562_v45  ;;  %v670_v55 = vand.u32 2147483647, %v2565_v46  ;;  %v2596_v0 = vadd.f32 %v2551_v37, %v498_v38  ;;  %v2600_v5 = vadd.f32 %v2551_v37, %v562_v39 }
 0x134   : > { %v688_v56 = vsub.f32 0.0, %v656_v49  ;;  %v704_v60 = vsub.f32 0.0, %v672_v52  ;;  %v657_v4 = vand.u32 2147483647, %v2582_v57  ;;  %v673_v11 = vand.u32 2147483647, %v2589_v61 }
 0x135   : > { %v686_v1 = vsub.f32 0.0, %v654_v54  ;;  %v702_v2 = vsub.f32 0.0, %v670_v55  ;;  %v655_v14 = vand.u32 2147483647, %v2596_v0  ;;  %v671_v19 = vand.u32 2147483647, %v2600_v5 }
 0x136   : > { %v722_v3 = vmul.f32 1.442695, %v688_v56  ;;  %v754_v10 = vmul.f32 1.442695, %v704_v60  ;;  %v689_v18 = vsub.f32 0.0, %v657_v4  ;;  %v705_v23 = vsub.f32 0.0, %v673_v11 }
 0x137   : > { %v2007_v42 = vpop.f32.mrb[4].mxu0  ;;  %v2023_v43 = vpop.f32.mrb[4].mxu1  ;;  %v718_v16 = vmul.f32 1.442695, %v686_v1  ;;  %v750_v22 = vmul.f32 1.442695, %v702_v2 }
 0x138   : > { %v2559_v44 = vpop.f32.mrb[5].mxu0  ;;  %v2567_v47 = vpop.f32.mrb[5].mxu1  ;;  %v2613_v15 = vadd.f32 %v2007_v42, %v2551_v37  ;;  %v2616_v17 = vadd.f32 %v2023_v43, %v2551_v37  ;;  %2124 = vpow2.f32 %v722_v3  ;;  %v687_v26 = vsub.f32 0.0, %v655_v14 }
 0x139   : > { %v2569_v48 = vpop.f32.mrb[6].mxu0  ;;  %v2572_v50 = vpop.f32.mrb[6].mxu1  ;;  %2126 = vpow2.f32 %v754_v10  ;;  %v724_v32 = vmul.f32 1.442695, %v689_v18  ;;  %v703_v33 = vsub.f32 0.0, %v671_v19  ;;  %v2639_v43 = vadd.f32 %v2551_v37, %v2559_v44 }
 0x13a   : > { %v2574_v51 = vpop.f32.mrb[7].mxu0  ;;  %v2577_v53 = vpop.f32.mrb[7].mxu1  ;;  %v660_v27 = vand.u32 2147483647, %v2613_v15  ;;  %2128 = vpow2.f32 %v718_v16  ;;  %v676_v30 = vand.u32 2147483647, %v2616_v17 }
 0x13b   : > { %2130 = vpow2.f32 %v750_v22  ;;  %v756_v35 = vmul.f32 1.442695, %v705_v23  ;;  %v720_v36 = vmul.f32 1.442695, %v687_v26  ;;  %v752_v42 = vmul.f32 1.442695, %v703_v33 }
 0x13c   : > { %v692_v38 = vsub.f32 0.0, %v660_v27  ;;  %v708_v39 = vsub.f32 0.0, %v676_v30  ;;  %2132 = vpow2.f32 %v724_v32  ;;  %v658_v2 = vand.u32 2147483647, %v2639_v43 }
 0x13d   : > { %2134 = vpow2.f32 %v756_v35  ;;  %v2664_v26 = vadd.f32 %v2551_v37, %v2567_v47  ;;  %v2670_v33 = vadd.f32 %v2569_v48, %v2551_v37 }
 0x13e   : > { %2136 = vpow2.f32 %v720_v36  ;;  %v730_v52 = vmul.f32 1.442695, %v692_v38  ;;  %v762_v56 = vmul.f32 1.442695, %v708_v39  ;;  %v690_v32 = vsub.f32 0.0, %v658_v2 }
 0x13f   : > { %v2584_v58 = vpop.f32.mrb[8].mxu0  ;;  %v2586_v59 = vpop.f32.mrb[8].mxu1  ;;  %2138 = vpow2.f32 %v752_v42  ;;  %3605 = vst [vmem:[#allocation16_spill] sm:$0xff] %v2670_v33  ;;  %v2676_v38 = vadd.f32 %v2572_v50, %v2551_v37  ;;  %v661_v30 = vand.u32 2147483647, %v2670_v33 }
 0x140   : > { %v2591_v62 = vpop.f32.mrb[9].mxu0  ;;  %v2593_v63 = vpop.f32.mrb[9].mxu1  ;;  %2140 = vpow2.f32 %v730_v52 }
 0x141   : > { %v2602_v6 = vpop.f32.mrb[10].mxu0  ;;  %v2604_v8 = vpop.f32.mrb[10].mxu1  ;;  %2142 = vpow2.f32 %v762_v56 }
 0x142   : > { %v2607_v12 = vpop.f32.mrb[11].mxu0  ;;  %v2609_v13 = vpop.f32.mrb[11].mxu1 }
 0x143   : > { %v2641_v49 = vpop.eup %2124 }
 0x144   : > { %v2643_v54 = vpop.eup %2126  ;;  %v800_v44 = vadd.f32 1.0, %v2641_v49  ;;  %v803_v22 = vmul.f32 -0.5, %v2641_v49  ;;  %v806_v18 = vand.u32 2147483647, %v2641_v49 }
 0x145   : > { %v2649_v3 = vpop.eup %2128  ;;  %v944_v14 = vadd.f32 1.0, %v2643_v54  ;;  %v947_v23 = vmul.f32 -0.5, %v2643_v54  ;;  %v950_v52 = vand.u32 2147483647, %v2643_v54 }
 0x146   : > { %v2658_v19 = vpop.eup %2130  ;;  %v785_v27 = vmul.f32 -0.5, %v2649_v3  ;;  %2144 = vlog2.f32 %v800_v44  ;;  %v782_v39 = vadd.f32 1.0, %v2649_v3  ;;  %v804_v56 = vadd.f32 1.0, %v803_v22 }
 0x147   : > { %v2619_v20 = vpop.f32.mrb[12].mxu0  ;;  %v2621_v21 = vpop.f32.mrb[12].mxu1  ;;  %2146 = vlog2.f32 %v944_v14  ;;  %v929_v42 = vmul.f32 -0.5, %v2658_v19  ;;  %v948_v2 = vadd.f32 1.0, %v947_v23  ;;  %v674_v44 = vand.u32 2147483647, %v2664_v26 }
 0x148   : > { %3598 = vst [vmem:[#allocation9_spill] sm:$0xff] %v2621_v21  ;;  %v2623_v24 = vpop.f32.mrb[13].mxu0  ;;  %v2625_v25 = vpop.f32.mrb[13].mxu1  ;;  %v786_v50 = vadd.f32 1.0, %v785_v27  ;;  %v926_v35 = vadd.f32 1.0, %v2658_v19  ;;  %v2696_v22 = vadd.f32 %v2551_v37, %v2574_v51  ;;  %2148 = vlog2.f32 %v782_v39 }
 0x149   : > { %3599 = vst [vmem:[#allocation10_spill] sm:$0xff] %v2623_v24  ;;  %3600 = vst [vmem:[#allocation11_spill] sm:$0xff] %v2625_v25  ;;  %v2628_v28 = vpop.f32.mrb[14].mxu0  ;;  %v2630_v29 = vpop.f32.mrb[14].mxu1  ;;  %v726_v14 = vmul.f32 1.442695, %v690_v32  ;;  %v2703_v11 = vmul.f32 %v2641_v49, %v804_v56  ;;  %v2706_v10 = vmul.f32 %v2643_v54, %v948_v2  ;;  %v2782_v49 = vadd.f32 %v2586_v59, %v2551_v37 }
 0x14a   : > { %3601 = vst [vmem:[#allocation12_spill] sm:$0xff] %v2628_v28  ;;  %3602 = vst [vmem:[#allocation13_spill] sm:$0xff] %v2630_v29  ;;  %v2633_v31 = vpop.f32.mrb[15].mxu0  ;;  %v2635_v34 = vpop.f32.mrb[15].mxu1  ;;  %v930_v7 = vadd.f32 1.0, %v929_v42  ;;  %v2713_v60 = vmul.f32 %v2649_v3, %v786_v50  ;;  %2150 = vlog2.f32 %v926_v35  ;;  %v706_v2 = vsub.f32 0.0, %v674_v44 }
 0x14b   : > { %3603 = vst [vmem:[#allocation14_spill] sm:$0xff] %v2633_v31  ;;  %3604 = vst [vmem:[#allocation15_spill] sm:$0xff] %v2635_v34  ;;  %v2678_v47 = vpop.eup %2132  ;;  %v788_v4 = vand.u32 2147483647, %v2649_v3  ;;  %v932_v39 = vand.u32 2147483647, %v2658_v19  ;;  %v2737_v44 = vadd.f32 %v2551_v37, %v2577_v53 }
 0x14c   : > { %v2683_v48 = vpop.eup %2134  ;;  %v809_v16 = vadd.f32 1.0, %v2678_v47  ;;  %v812_v27 = vmul.f32 -0.5, %v2678_v47  ;;  %v815_v42 = vand.u32 2147483647, %v2678_v47  ;;  %vm2719_vm0 = vcmp.lt.f32.partialorder %v806_v18, 0.0004427343 }
 0x14d   : > { %v2687_v36 = vpop.eup %2136  ;;  %v953_v32 = vadd.f32 1.0, %v2683_v48  ;;  %v956_v54 = vmul.f32 -0.5, %v2683_v48  ;;  %vm2725_vm1 = vcmp.lt.f32.partialorder %v950_v52, 0.0004427343  ;;  %v2730_v35 = vmul.f32 %v2658_v19, %v930_v7 }
 0x14e   : > { %v2698_v23 = vpop.eup %2138  ;;  %v791_v1 = vadd.f32 1.0, %v2687_v36  ;;  %2152 = vlog2.f32 %v809_v16  ;;  %v813_v50 = vadd.f32 1.0, %v812_v27  ;;  %v677_v18 = vand.u32 2147483647, %v2676_v38 }
 0x14f   : > { %v2710_v51 = vpop.eup %2140  ;;  %v935_v56 = vadd.f32 1.0, %v2698_v23  ;;  %2154 = vlog2.f32 %v953_v32  ;;  %v959_v34 = vand.u32 2147483647, %v2683_v48  ;;  %v693_v31 = vsub.f32 0.0, %v661_v30 }
 0x150   : > { %v2717_v55 = vpop.eup %2142  ;;  %2156 = vlog2.f32 %v791_v1  ;;  %v836_v16 = vadd.f32 1.0, %v2710_v51  ;;  %v659_v7 = vand.u32 2147483647, %v2696_v22  ;;  %v2743_v19 = vadd.f32 %v2584_v58, %v2551_v37 }
 0x151   : > { %v2145_v9 = vpop.eup %2144  ;;  %v980_v25 = vadd.f32 1.0, %v2717_v55  ;;  %v957_v27 = vadd.f32 1.0, %v956_v54  ;;  %v794_v32 = vmul.f32 -0.5, %v2687_v36  ;;  %2158 = vlog2.f32 %v935_v56 }
 0x152   : > { %v2147_v52 = vpop.eup %2146  ;;  %v758_v1 = vmul.f32 1.442695, %v706_v2  ;;  %v802_v29 = vmul.f32 0.6931472, %v2145_v9  ;;  %vm2746_vm2 = vcmp.lt.f32.partialorder %v788_v4, 0.0004427343  ;;  %2160 = vpow2.f32 %v726_v14 }
 0x153   : > { %v938_v53 = vmul.f32 -0.5, %v2698_v23  ;;  %v709_v30 = vsub.f32 0.0, %v677_v18  ;;  %v946_v28 = vmul.f32 0.6931472, %v2147_v52  ;;  %v2752_v21 = vmul.f32 %v2678_v47, %v813_v50  ;;  %v2149_v54 = vpop.eup %2148 }
 0x154   : > { %2162 = vlog2.f32 %v836_v16  ;;  %v675_v58 = vand.u32 2147483647, %v2737_v44  ;;  %vm2755_vm3 = vcmp.lt.f32.partialorder %v932_v39, 0.0004427343  ;;  %v732_v9 = vmul.f32 1.442695, %v693_v31  ;;  %v2151_v39 = vpop.eup %2150 }
 0x155   : > { %2164 = vlog2.f32 %v980_v25  ;;  %v691_v4 = vsub.f32 0.0, %v659_v7  ;;  %v664_v2 = vand.u32 2147483647, %v2743_v19  ;;  %vm2760_vm4 = vcmp.lt.f32.partialorder %v815_v42, 0.0004427343 }
 0x156   : > { %v2765_v47 = vmul.f32 %v2683_v48, %v957_v27  ;;  %v795_v50 = vadd.f32 1.0, %v794_v32  ;;  %v797_v18 = vand.u32 2147483647, %v2687_v36  ;;  %2166 = vpow2.f32 %v758_v1 }
 0x157   : > { %v808_v25 = vsel %vm2719_vm0, %v2703_v11, %v802_v29  ;;  %v939_v31 = vadd.f32 1.0, %v938_v53  ;;  %v941_v16 = vand.u32 2147483647, %v2698_v23  ;;  %v764_v52 = vmul.f32 1.442695, %v709_v30 }
 0x158   : > { %v2153_v42 = vpop.eup %2152  ;;  %v952_v7 = vsel %vm2725_vm1, %v2706_v10, %v946_v28  ;;  %v784_v48 = vmul.f32 0.6931472, %v2149_v54  ;;  %v839_v27 = vmul.f32 -0.5, %v2710_v51  ;;  %v707_v32 = vsub.f32 0.0, %v675_v58 }
 0x159   : > { %v2155_v33 = vpop.eup %2154  ;;  %vm2776_vm5 = vcmp.lt.f32.partialorder %v959_v34, 0.0004427343  ;;  %2168 = vpow2.f32 %v732_v9  ;;  %v728_v29 = vmul.f32 1.442695, %v691_v4  ;;  %v696_v11 = vsub.f32 0.0, %v664_v2 }
 0x15a   : > { %v2157_v53 = vpop.eup %2156  ;;  %v3618_v3 = vmax.f32 %v2554_v40, 0.0  ;;  %v928_v10 = vmul.f32 0.6931472, %v2151_v39  ;;  %v796_v30 = vmul.f32 %v2687_v36, %v795_v50  ;;  %vm2789_vm6 = vcmp.lt.f32.partialorder %v797_v18, 0.0004427343 }
 0x15b   : > { %v811_v58 = vmul.f32 0.6931472, %v2153_v42  ;;  %vm2793_vm7 = vcmp.lt.f32.partialorder %v941_v16, 0.0004427343  ;;  %v842_v59 = vand.u32 2147483647, %v2710_v51  ;;  %2170 = vpow2.f32 %v764_v52  ;;  %v2159_v40 = vpop.eup %2158 }
 0x15c   : > { %v2786_v28 = vadd.f32 %v808_v25, %v3618_v3  ;;  %v983_v9 = vmul.f32 -0.5, %v2717_v55  ;;  %v3623_v4 = vmax.f32 %v2557_v41, 0.0  ;;  %v790_v36 = vsel %vm2746_vm2, %v2713_v60, %v784_v48  ;;  %v2807_v39 = vpop.eup %2160 }
 0x15d   : > { %v940_v50 = vmul.f32 %v2698_v23, %v939_v31  ;;  %v760_v18 = vmul.f32 1.442695, %v707_v32  ;;  %v840_v25 = vadd.f32 1.0, %v839_v27  ;;  %2172 = vpow2.f32 %v728_v29 }
 0x15e   : > { %v2801_v2 = vadd.f32 %v952_v7, %v3623_v4  ;;  %v738_v16 = vmul.f32 1.442695, %v696_v11  ;;  %v680_v42 = vand.u32 2147483647, %v2782_v49  ;;  %v2163_v52 = vpop.eup %2162  ;;  %v934_v41 = vsel %vm2755_vm3, %v2730_v35, %v928_v10 }
 0x15f   : > { %v955_v7 = vmul.f32 0.6931472, %v2155_v33  ;;  %v793_v3 = vmul.f32 0.6931472, %v2157_v53  ;;  %v986_v24 = vand.u32 2147483647, %v2717_v55  ;;  %v2165_v60 = vpop.eup %2164  ;;  %v817_v48 = vsel %vm2760_vm4, %v2752_v21, %v811_v58 }
 0x160   : > { %v3624_v23 = vmax.f32 %v2562_v45, 0.0  ;;  %vm2821_vm8 = vcmp.lt.f32.partialorder %v842_v59, 0.0004427343  ;;  %v984_v32 = vadd.f32 1.0, %v983_v9  ;;  %v2825_v56 = vpop.eup %2166  ;;  %v937_v33 = vmul.f32 0.6931472, %v2159_v40 }
 0x161   : > { %v818_v35 = vadd.f32 1.0, %v2807_v39  ;;  %2174 = vpow2.f32 %v760_v18  ;;  %v2830_v45 = vadd.f32 %v2551_v37, %v2591_v62  ;;  %v3627_v29 = vmax.f32 %v2565_v46, 0.0 }
 0x162   : > { %v2816_v31 = vadd.f32 %v790_v36, %v3624_v23  ;;  %v841_v21 = vmul.f32 %v2710_v51, %v840_v25  ;;  %2176 = vpow2.f32 %v738_v16  ;;  %v712_v14 = vsub.f32 0.0, %v680_v42 }
 0x163   : > { %v2834_v11 = vadd.f32 %v934_v41, %v3627_v29  ;;  %v961_v53 = vsel %vm2776_vm5, %v2765_v47, %v955_v7  ;;  %v799_v10 = vsel %vm2789_vm6, %v796_v30, %v793_v3  ;;  %v838_v58 = vmul.f32 0.6931472, %v2163_v52  ;;  %v2846_v62 = vpop.eup %2168 }
 0x164   : > { %vm2842_vm9 = vcmp.lt.f32.partialorder %v986_v24, 0.0004427343  ;;  %v3630_v46 = vmax.f32 %v2582_v57, 0.0  ;;  %v982_v51 = vmul.f32 0.6931472, %v2165_v60  ;;  %v985_v40 = vmul.f32 %v2717_v55, %v984_v32 }
 0x165   : > { %v962_v1 = vadd.f32 1.0, %v2825_v56  ;;  %v943_v47 = vsel %vm2793_vm7, %v940_v50, %v937_v33  ;;  %2178 = vlog2.f32 %v818_v35  ;;  %v662_v30 = vand.u32 2147483647, %v2830_v45  ;;  %v2861_v4 = vpop.eup %2170 }
 0x166   : > { %v2850_v9 = vadd.f32 %v817_v48, %v3630_v46  ;;  %v2859_v34 = vadd.f32 %v2551_v37, %v2593_v63  ;;  %v3631_v57 = vmax.f32 %v2589_v61, 0.0  ;;  %v3632_v55 = vmax.f32 %v2596_v0, 0.0 }
 0x167   : > { %v645_v54 = vmax.f32 %v2676_v38, 0.0  ;;  %v770_v50 = vmul.f32 1.442695, %v712_v14  ;;  %v844_v25 = vsel %vm2821_vm8, %v841_v21, %v838_v58  ;;  %v821_v16 = vmul.f32 -0.5, %v2807_v39  ;;  %v2877_v52 = vpop.eup %2172 }
 0x168   : > { %v2865_v36 = vadd.f32 %v961_v53, %v3631_v57  ;;  %v2869_v18 = vadd.f32 %v799_v10, %v3632_v55  ;;  %v845_v63 = vadd.f32 1.0, %v2846_v62  ;;  %v627_v42 = vmax.f32 %v2696_v22, 0.0 }
 0x169   : > { %v3633_v61 = vmax.f32 %v2600_v5, 0.0  ;;  %v988_v0 = vsel %vm2842_vm9, %v985_v40, %v982_v51  ;;  %2180 = vlog2.f32 %v962_v1  ;;  %v643_v7 = vmax.f32 %v2737_v44, 0.0  ;;  %v3658_v44 = vld [vmem:[#allocation10_spill] sm:$0xff] }
 0x16a   : > { %v965_v3 = vmul.f32 -0.5, %v2825_v56  ;;  %v989_v24 = vadd.f32 1.0, %v2861_v4  ;;  %v694_v60 = vsub.f32 0.0, %v662_v30  ;;  %v678_v23 = vand.u32 2147483647, %v2859_v34 }
 0x16b   : > { %v2881_v41 = vadd.f32 %v943_v47, %v3633_v61  ;;  %v3634_v48 = vmax.f32 %v2613_v15, 0.0  ;;  %v824_v5 = vand.u32 2147483647, %v2807_v39  ;;  %2182 = vpow2.f32 %v770_v50  ;;  %v2898_v33 = vpop.eup %2174 }
 0x16c   : > { %v2896_v32 = vadd.f32 %v2602_v6, %v2551_v37  ;;  %v822_v35 = vadd.f32 1.0, %v821_v16  ;;  %2184 = vlog2.f32 %v845_v63  ;;  %v827_v29 = vadd.f32 1.0, %v2877_v52  ;;  %v2902_v14 = vpop.eup %2176 }
 0x16d   : > { %v2891_v27 = vadd.f32 %v844_v25, %v3634_v48  ;;  %v632_v21 = vmax.f32 %v2743_v19, 0.0  ;;  %v3635_v15 = vmax.f32 %v2616_v17, 0.0  ;;  %v968_v10 = vand.u32 2147483647, %v2825_v56 }
 0x16e   : > { %v848_v58 = vmul.f32 -0.5, %v2846_v62  ;;  %v648_v6 = vmax.f32 %v2782_v49, 0.0  ;;  %v966_v59 = vadd.f32 1.0, %v965_v3  ;;  %2186 = vlog2.f32 %v989_v24 }
 0x16f   : > { %v2906_v53 = vadd.f32 %v988_v0, %v3635_v15  ;;  %v734_v46 = vmul.f32 1.442695, %v694_v60  ;;  %v710_v51 = vsub.f32 0.0, %v678_v23  ;;  %vm2911_vm10 = vcmp.lt.f32.partialorder %v824_v5, 0.0004427343  ;;  %v2179_v30 = vpop.eup %2178 }
 0x170   : > { %v971_v1 = vadd.f32 1.0, %v2898_v33  ;;  %v665_v17 = vand.u32 2147483647, %v2896_v32  ;;  %v2919_v47 = vadd.f32 %v2604_v8, %v2551_v37  ;;  %v823_v57 = vmul.f32 %v2807_v39, %v822_v35 }
 0x171   : > { %v851_v55 = vand.u32 2147483647, %v2846_v62  ;;  %2188 = vlog2.f32 %v827_v29  ;;  %v872_v50 = vadd.f32 1.0, %v2902_v14  ;;  %vm2924_vm11 = vcmp.lt.f32.partialorder %v968_v10, 0.0004427343 }
 0x172   : > { %v849_v16 = vadd.f32 1.0, %v848_v58  ;;  %v992_v63 = vmul.f32 -0.5, %v2861_v4  ;;  %v630_v61 = vmax.f32 %v2830_v45, 0.0  ;;  %v967_v8 = vmul.f32 %v2825_v56, %v966_v59 }
 0x173   : > { %v830_v0 = vmul.f32 -0.5, %v2877_v52  ;;  %2190 = vpow2.f32 %v734_v46  ;;  %v766_v39 = vmul.f32 1.442695, %v710_v51  ;;  %v2181_v3 = vpop.eup %2180  ;;  %v820_v24 = vmul.f32 0.6931472, %v2179_v30 }
 0x174   : > { %2192 = vlog2.f32 %v971_v1  ;;  %v697_v60 = vsub.f32 0.0, %v665_v17  ;;  %v681_v23 = vand.u32 2147483647, %v2919_v47  ;;  %vm2933_vm12 = vcmp.lt.f32.partialorder %v851_v55, 0.0004427343 }
 0x175   : > { %v995_v5 = vand.u32 2147483647, %v2861_v4  ;;  %2194 = vlog2.f32 %v872_v50  ;;  %v2939_v56 = vpop.eup %2182  ;;  %v850_v29 = vmul.f32 %v2846_v62, %v849_v16  ;;  %v993_v15 = vadd.f32 1.0, %v992_v63 }
 0x176   : > { %v833_v10 = vand.u32 2147483647, %v2877_v52  ;;  %v974_v58 = vmul.f32 -0.5, %v2898_v33  ;;  %v2185_v59 = vpop.eup %2184  ;;  %v964_v46 = vmul.f32 0.6931472, %v2181_v3  ;;  %v831_v51 = vadd.f32 1.0, %v830_v0 }
 0x177   : > { %v2947_v17 = vadd.f32 %v2551_v37, %v2607_v12  ;;  %v826_v30 = vsel %vm2911_vm10, %v823_v57, %v820_v24  ;;  %2196 = vpow2.f32 %v766_v39  ;;  %v740_v55 = vmul.f32 1.442695, %v697_v60 }
 0x178   : > { %v713_v62 = vsub.f32 0.0, %v681_v23  ;;  %v2187_v50 = vpop.eup %2186  ;;  %vm2951_vm13 = vcmp.lt.f32.partialorder %v995_v5, 0.0004427343  ;;  %v977_v63 = vand.u32 2147483647, %v2898_v33  ;;  %v875_v0 = vmul.f32 -0.5, %v2902_v14 }
 0x179   : > { %v1016_v3 = vadd.f32 1.0, %v2939_v56  ;;  %v847_v1 = vmul.f32 0.6931472, %v2185_v59  ;;  %v994_v12 = vmul.f32 %v2861_v4, %v993_v15  ;;  %vm2959_vm14 = vcmp.lt.f32.partialorder %v833_v10, 0.0004427343 }
 0x17a   : > { %v975_v57 = vadd.f32 1.0, %v974_v58  ;;  %v3646_v24 = vmax.f32 %v2639_v43, 0.0  ;;  %v970_v23 = vsel %vm2924_vm11, %v967_v8, %v964_v46  ;;  %v832_v5 = vmul.f32 %v2877_v52, %v831_v51  ;;  %v3657_v43 = vld [vmem:[#allocation12_spill] sm:$0xff] }
 0x17b   : > { %v2189_v39 = vpop.eup %2188  ;;  %v663_v35 = vand.u32 2147483647, %v2947_v17  ;;  %v991_v59 = vmul.f32 0.6931472, %v2187_v50  ;;  %2198 = vpow2.f32 %v740_v55  ;;  %v772_v4 = vmul.f32 1.442695, %v713_v62 }
 0x17c   : > { %v2965_v60 = vadd.f32 %v826_v30, %v3646_v24  ;;  %v2973_v15 = vadd.f32 %v2551_v37, %v2609_v13  ;;  %vm2977_vm15 = vcmp.lt.f32.partialorder %v977_v63, 0.0004427343  ;;  %v876_v58 = vadd.f32 1.0, %v875_v0 }
 0x17d   : > { %v2975_v10 = vpop.eup %2190  ;;  %v878_v25 = vand.u32 2147483647, %v2902_v14  ;;  %2200 = vlog2.f32 %v1016_v3  ;;  %v853_v8 = vsel %vm2933_vm12, %v850_v29, %v847_v1  ;;  %v829_v46 = vmul.f32 0.6931472, %v2189_v39  ;;  %v3650_v1 = vld [vmem:[#allocation16_spill] sm:$0xff] }
 0x17e   : > { %v2193_v52 = vpop.eup %2192  ;;  %v976_v51 = vmul.f32 %v2898_v33, %v975_v57  ;;  %v1019_v13 = vmul.f32 -0.5, %v2939_v56  ;;  %v3649_v55 = vmax.f32 %v2664_v26, 0.0  ;;  %v1022_v50 = vand.u32 2147483647, %v2939_v56 }
 0x17f   : > { %v2195_v30 = vpop.eup %2194  ;;  %v695_v63 = vsub.f32 0.0, %v663_v35  ;;  %v2993_v0 = vadd.f32 %v2619_v20, %v2551_v37  ;;  %v997_v48 = vsel %vm2951_vm13, %v994_v12, %v991_v59  ;;  %v854_v29 = vadd.f32 1.0, %v2975_v10 }
 0x180   : > { %v2988_v62 = vadd.f32 %v970_v23, %v3649_v55  ;;  %2202 = vpow2.f32 %v772_v4  ;;  %v679_v33 = vand.u32 2147483647, %v2973_v15  ;;  %v3651_v3 = vmax.f32 %v3650_v1, 0.0 }
 0x181   : > { %v973_v57 = vmul.f32 0.6931472, %v2193_v52  ;;  %v877_v39 = vmul.f32 %v2902_v14, %v876_v58  ;;  %vm3004_vm0 = vcmp.lt.f32.partialorder %v878_v25, 0.0004427343  ;;  %v2197_v20 = vpop.eup %2196  ;;  %v835_v16 = vsel %vm2959_vm14, %v832_v5, %v829_v46 }
 0x182   : > { %v3001_v26 = vadd.f32 %v853_v8, %v3651_v3  ;;  %v874_v12 = vmul.f32 0.6931472, %v2195_v30  ;;  %v1020_v24 = vadd.f32 1.0, %v1019_v13  ;;  %v3013_v59 = vadd.f32 %v997_v48, %v645_v54 }
 0x183   : > { %vm3015_vm1 = vcmp.lt.f32.partialorder %v1022_v50, 0.0004427343  ;;  %v736_v58 = vmul.f32 1.442695, %v695_v63  ;;  %2204 = vlog2.f32 %v854_v29  ;;  %v711_v40 = vsub.f32 0.0, %v679_v33  ;;  %v3656_v50 = vld [vmem:[#allocation9_spill] sm:$0xff] }
 0x184   : > { %v668_v5 = vand.u32 2147483647, %v2993_v0  ;;  %v3024_v52 = vadd.f32 %v835_v16, %v627_v42  ;;  %v979_v38 = vsel %vm2977_vm15, %v976_v51, %v973_v57  ;;  %v857_v54 = vmul.f32 -0.5, %v2975_v10 }
 0x185   : > { %v998_v8 = vadd.f32 1.0, %v2197_v20  ;;  %v2199_v46 = vpop.eup %2198  ;;  %v880_v13 = vsel %vm3004_vm0, %v877_v39, %v874_v12  ;;  %v1021_v30 = vmul.f32 %v2939_v56, %v1020_v24  ;;  %v1001_v55 = vmul.f32 -0.5, %v2197_v20 }
 0x186   : > { %v3034_v63 = vadd.f32 %v3656_v50, %v2551_v37  ;;  %v860_v42 = vand.u32 2147483647, %v2975_v10  ;;  %v884_v48 = vmul.f32 -0.5, %v2199_v46  ;;  %2206 = vpow2.f32 %v736_v58 }
 0x187   : > { %v2201_v22 = vpop.eup %2200  ;;  %v3039_v51 = vadd.f32 %v3657_v43, %v2551_v37  ;;  %v3043_v29 = vadd.f32 %v979_v38, %v643_v7  ;;  %v768_v33 = vmul.f32 1.442695, %v711_v40  ;;  %v700_v1 = vsub.f32 0.0, %v668_v5  ;;  %v3661_v40 = vld [vmem:[#allocation13_spill] sm:$0xff] }
 0x188   : > { %v3048_v3 = vadd.f32 %v880_v13, %v632_v21  ;;  %v858_v57 = vadd.f32 1.0, %v857_v54  ;;  %2208 = vlog2.f32 %v998_v8  ;;  %v881_v39 = vadd.f32 1.0, %v2199_v46 }
 0x189   : > { %v1018_v16 = vmul.f32 0.6931472, %v2201_v22  ;;  %v1002_v12 = vadd.f32 1.0, %v1001_v55  ;;  %v684_v24 = vand.u32 2147483647, %v3034_v63  ;;  %v3055_v7 = vadd.f32 %v2551_v37, %v3658_v44 }
 0x18a   : > { %v3050_v35 = vpop.eup %2202  ;;  %vm3057_vm2 = vcmp.lt.f32.partialorder %v860_v42, 0.0004427343  ;;  %v885_v19 = vadd.f32 1.0, %v884_v48  ;;  %v669_v21 = vand.u32 2147483647, %v3039_v51  ;;  %v3064_v5 = vadd.f32 %v3661_v40, %v2551_v37 }
 0x18b   : > { %v1004_v38 = vand.u32 2147483647, %v2197_v20  ;;  %v1028_v54 = vmul.f32 -0.5, %v3050_v35  ;;  %2210 = vpow2.f32 %v768_v33  ;;  %v746_v8 = vmul.f32 1.442695, %v700_v1  ;;  %v3662_v1 = vld [vmem:[#allocation14_spill] sm:$0xff] }
 0x18c   : > { %v3068_v13 = vmul.f32 %v2975_v10, %v858_v57  ;;  %2212 = vlog2.f32 %v881_v39  ;;  %v887_v55 = vand.u32 2147483647, %v2199_v46  ;;  %v1025_v50 = vadd.f32 1.0, %v3050_v35 }
 0x18d   : > { %vm1173_vm3 = vcmask 523264   ;;  %v2205_v22 = vpop.eup %2204  ;;  %v1024_v42 = vsel %vm3015_vm1, %v1021_v30, %v1018_v16  ;;  %v3073_v48 = vmul.f32 %v2197_v20, %v1002_v12  ;;  %v716_v43 = vsub.f32 0.0, %v684_v24  ;;  %v3665_v30 = vld [vmem:[#allocation11_spill] sm:$0xff] }
 0x18e   : > { %v666_v44 = vand.u32 2147483647, %v3055_v7  ;;  %v3076_v40 = vmul.f32 %v2199_v46, %v885_v19  ;;  %v701_v33 = vsub.f32 0.0, %v669_v21  ;;  %v685_v10 = vand.u32 2147483647, %v3064_v5 }
 0x18f   : > { %v3081_v57 = vadd.f32 %v2551_v37, %v3662_v1  ;;  %vm3083_vm4 = vcmp.lt.f32.partialorder %v1004_v38, 0.0004427343  ;;  %v1029_v4 = vadd.f32 1.0, %v1028_v54  ;;  %2214 = vpow2.f32 %v746_v8  ;;  %v3102_v21 = vld [vmem:[%s3584_s3] ss:$0 sm:$0xff] }
 0x190   : > { %v3090_v16 = vadd.f32 %v2551_v37, %v3665_v30  ;;  %v3092_v46 = vpop.eup %2206  ;;  %v3096_v12 = vadd.f32 %v1024_v42, %v648_v6  ;;  %v856_v24 = vmul.f32 0.6931472, %v2205_v22  ;;  %2216 = vlog2.f32 %v1025_v50  ;;  %v3668_v54 = vld [vmem:[#allocation15_spill] sm:$0xff] }
 0x191   : > { %v1031_v19 = vand.u32 2147483647, %v3050_v35  ;;  %v778_v38 = vmul.f32 1.442695, %v716_v43  ;;  %v698_v8 = vsub.f32 0.0, %v666_v44  ;;  %v866_v6 = vmul.f32 -0.5, %v3092_v46 }
 0x192   : > { %v2209_v30 = vpop.eup %2208  ;;  %vm3106_vm5 = vcmp.lt.f32.partialorder %v887_v55, 0.0004427343  ;;  %v748_v50 = vmul.f32 1.442695, %v701_v33  ;;  %v717_v22 = vsub.f32 0.0, %v685_v10  ;;  %v3113_v20 = vmul.f32 %v3050_v35, %v1029_v4 }
 0x193   : > { %v667_v42 = vand.u32 2147483647, %v3081_v57  ;;  %v863_v43 = vadd.f32 1.0, %v3092_v46  ;;  %v3118_v44 = vadd.f32 %v2551_v37, %v3668_v54  ;;  %v1941_v55 = vadd.f32 -0.6931472, %v2801_v2 }
 0x194   : > { %v862_v1 = vsel %vm3057_vm2, %v3068_v13, %v856_v24  ;;  %v869_v33 = vand.u32 2147483647, %v3092_v46  ;;  %v682_v10 = vand.u32 2147483647, %v3090_v16  ;;  %v1925_v56 = vadd.f32 -0.6931472, %v2786_v28 }
 0x195   : > { %v3127_v35 = vpop.eup %2210  ;;  %v1000_v4 = vmul.f32 0.6931472, %v2209_v30  ;;  %2218 = vpow2.f32 %v778_v38  ;;  %v742_v25 = vmul.f32 1.442695, %v698_v8  ;;  %v1159_v37 = vmul.f32 %v3102_v21, %v1941_v55 }
 0x196   : > { %v2213_v54 = vpop.eup %2212  ;;  %v867_v14 = vadd.f32 1.0, %v866_v6  ;;  %2220 = vpow2.f32 %v748_v50  ;;  %v780_v2 = vmul.f32 1.442695, %v717_v22  ;;  %v699_v23 = vsub.f32 0.0, %v667_v42 }
 0x197   : > { %vm3130_vm6 = vcmp.lt.f32.partialorder %v1031_v19, 0.0004427343  ;;  %v683_v13 = vand.u32 2147483647, %v3118_v44  ;;  %v1228_v28 = vsel %vm1173_vm3, %v1159_v37, 0.0  ;;  %v1143_v24 = vmul.f32 %v3102_v21, %v1925_v56 }
 0x198   : > { %v1926_v38 = vadd.f32 -0.6931472, %v2850_v9  ;;  %2222 = vlog2.f32 %v863_v43  ;;  %v1007_v8 = vadd.f32 1.0, %v3127_v35  ;;  %v714_v30 = vsub.f32 0.0, %v682_v10  ;;  %1229 = vadd.xlane.f32.xlu0 %v1228_v28 }
 0x199   : > { %v1923_v6 = vadd.f32 -0.6931472, %v2816_v31  ;;  %v3140_v50 = vpop.eup %2214  ;;  %v3144_v19 = vadd.f32 %v862_v1, %v630_v61  ;;  %v883_v22 = vmul.f32 0.6931472, %v2213_v54  ;;  %v1010_v42 = vmul.f32 -0.5, %v3127_v35 }
 0x19a   : > { %2224 = vpow2.f32 %v742_v25  ;;  %v2217_v56 = vpop.eup %2216  ;;  %v1006_v9 = vsel %vm3083_vm4, %v3073_v48, %v1000_v4  ;;  %v3151_v43 = vmul.f32 %v3092_v46, %v867_v14  ;;  %v1180_v31 = vsel %vm1173_vm3, %v1143_v24, 0.0 }
 0x19b   : > { %v1942_v55 = vadd.f32 -0.6931472, %v2865_v36  ;;  %2226 = vpow2.f32 %v780_v2  ;;  %v744_v45 = vmul.f32 1.442695, %v699_v23  ;;  %v715_v61 = vsub.f32 0.0, %v683_v13  ;;  %1181 = vadd.xlane.f32.xlu1 %v1180_v31 }
 0x19c   : > { %v1144_v1 = vmul.f32 %v3102_v21, %v1926_v38  ;;  %2228 = vlog2.f32 %v1007_v8  ;;  %v774_v25 = vmul.f32 1.442695, %v714_v30  ;;  %v1141_v10 = vmul.f32 %v3102_v21, %v1923_v6 }
 0x19d   : > { %v1939_v39 = vadd.f32 -0.6931472, %v2834_v11  ;;  %v889_v14 = vsel %vm3106_vm5, %v3076_v40, %v883_v22  ;;  %v1027_v48 = vmul.f32 0.6931472, %v2217_v56  ;;  %v1011_v46 = vadd.f32 1.0, %v1010_v42 }
 0x19e   : > { %v1013_v36 = vand.u32 2147483647, %v3127_v35  ;;  %vm3162_vm7 = vcmp.lt.f32.partialorder %v869_v33, 0.0004427343  ;;  %v1183_v4 = vsel %vm1173_vm3, %v1144_v1, 0.0  ;;  %v1174_v37 = vsel %vm1173_vm3, %v1141_v10, 0.0 }
 0x19f   : > { %v1160_v54 = vmul.f32 %v3102_v21, %v1942_v55  ;;  %v1940_v11 = vadd.f32 -0.6931472, %v2881_v41  ;;  %v3170_v2 = vpop.eup %2218  ;;  %v3673_v40 = vmax.f32 %v2859_v34, 0.0  ;;  %2230 = vpow2.f32 %v744_v45  ;;  %1184 = vadd.xlane.f32.xlu1 %v1183_v4  ;;  %1175 = vadd.xlane.f32.xlu0 %v1174_v37 }
 0x1a0   : > { %v776_v13 = vmul.f32 1.442695, %v715_v61  ;;  %v1157_v33 = vmul.f32 %v3102_v21, %v1939_v39  ;;  %v3177_v28 = vpop.eup %2220  ;;  %v3674_v24 = vmax.f32 %v2896_v32, 0.0  ;;  %v908_v41 = vadd.f32 1.0, %v3140_v50 }
 0x1a1   : > { %v3174_v49 = vadd.f32 %v1006_v9, %v3673_v40  ;;  %v911_v8 = vmul.f32 -0.5, %v3140_v50  ;;  %2232 = vpow2.f32 %v774_v25  ;;  %v3186_v34 = vmul.f32 %v3127_v35, %v1011_v46 }
 0x1a2   : > { %v3181_v38 = vadd.f32 %v889_v14, %v3674_v24  ;;  %v914_v30 = vand.u32 2147483647, %v3140_v50  ;;  %v1924_v6 = vadd.f32 -0.6931472, %v2869_v18  ;;  %v1930_v22 = vadd.f32 -0.6931472, %v3001_v26  ;;  %v2223_v42 = vpop.eup %2222 }
 0x1a3   : > { %v1033_v32 = vsel %vm3130_vm6, %v3113_v20, %v1027_v48  ;;  %vm3194_vm8 = vcmp.lt.f32.partialorder %v1013_v36, 0.0004427343  ;;  %v1231_v9 = vsel %vm1173_vm3, %v1160_v54, 0.0  ;;  %v1222_v35 = vsel %vm1173_vm3, %v1157_v33, 0.0 }
 0x1a4   : > { %v1158_v31 = vmul.f32 %v3102_v21, %v1940_v11  ;;  %v3201_v55 = vpop.eup %2224  ;;  %v1052_v18 = vadd.f32 1.0, %v3170_v2  ;;  %2234 = vpow2.f32 %v776_v13  ;;  %1232 = vadd.xlane.f32.xlu1 %v1231_v9  ;;  %1223 = vadd.xlane.f32.xlu0 %v1222_v35  ;;  %v1142_v26 = vmul.f32 %v3102_v21, %v1924_v6 }
 0x1a5   : > { %v1929_v20 = vadd.f32 -0.6931472, %v2891_v27  ;;  %v912_v58 = vadd.f32 1.0, %v911_v8  ;;  %v1055_v45 = vmul.f32 -0.5, %v3170_v2  ;;  %v917_v61 = vadd.f32 1.0, %v3177_v28  ;;  %v3209_v25 = vpop.eup %2226 }
 0x1a6   : > { %v653_v1 = vmax.f32 %v3064_v5, 0.0  ;;  %v865_v10 = vmul.f32 0.6931472, %v2223_v42  ;;  %2236 = vlog2.f32 %v908_v41  ;;  %v1148_v39 = vmul.f32 %v3102_v21, %v1930_v22  ;;  %v2229_v48 = vpop.eup %2228 }
 0x1a7   : > { %v1946_v14 = vadd.f32 -0.6931472, %v3013_v59  ;;  %v3677_v46 = vmax.f32 %v2919_v47, 0.0  ;;  %v1225_v27 = vsel %vm1173_vm3, %v1158_v31, 0.0  ;;  %v1177_v4 = vsel %vm1173_vm3, %v1142_v26, 0.0 }
 0x1a8   : > { %v1147_v37 = vmul.f32 %v3102_v21, %v1929_v20  ;;  %2238 = vlog2.f32 %v1052_v18  ;;  %v890_v54 = vadd.f32 1.0, %v3201_v55  ;;  %v893_v11 = vmul.f32 -0.5, %v3201_v55  ;;  %1226 = vadd.xlane.f32.xlu1 %v1225_v27  ;;  %1178 = vadd.xlane.f32.xlu0 %v1177_v4 }
 0x1a9   : > { %v3215_v36 = vadd.f32 %v1033_v32, %v3677_v46  ;;  %v1945_v59 = vadd.f32 -0.6931472, %v2906_v53  ;;  %v3224_v40 = vmul.f32 %v3140_v50, %v912_v58  ;;  %v1056_v47 = vadd.f32 1.0, %v1055_v45  ;;  %v3227_v33 = vpop.eup %2230 }
 0x1aa   : > { %2240 = vlog2.f32 %v917_v61  ;;  %v1061_v13 = vadd.f32 1.0, %v3209_v25  ;;  %v871_v24 = vsel %vm3162_vm7, %v3151_v43, %v865_v10  ;;  %v1009_v41 = vmul.f32 0.6931472, %v2229_v48 }
 0x1ab   : > { %v1195_v8 = vsel %vm1173_vm3, %v1148_v39, 0.0  ;;  %v1164_v6 = vmul.f32 %v3102_v21, %v1946_v14  ;;  %v3234_v22 = vpop.eup %2232  ;;  %v1192_v53 = vsel %vm1173_vm3, %v1147_v37, 0.0  ;;  %v1163_v50 = vmul.f32 %v3102_v21, %v1945_v59 }
 0x1ac   : > { %v1928_v42 = vadd.f32 -0.6931472, %v3024_v52  ;;  %v1927_v32 = vadd.f32 -0.6931472, %v2965_v60  ;;  %v1058_v9 = vand.u32 2147483647, %v3170_v2  ;;  %2242 = vlog2.f32 %v890_v54  ;;  %1196 = vadd.xlane.f32.xlu1 %v1195_v8  ;;  %1193 = vadd.xlane.f32.xlu0 %v1192_v53 }
 0x1ad   : > { %v894_v23 = vadd.f32 1.0, %v893_v11  ;;  %v896_v43 = vand.u32 2147483647, %v3201_v55  ;;  %v3678_v35 = vmax.f32 %v2947_v17, 0.0  ;;  %vm3246_vm9 = vcmp.lt.f32.partialorder %v914_v30, 0.0004427343 }
 0x1ae   : > { %v3251_v52 = vmul.f32 %v3170_v2, %v1056_v47  ;;  %2244 = vlog2.f32 %v1061_v13  ;;  %v899_v60 = vadd.f32 1.0, %v3227_v33  ;;  %v3254_v26 = vpop.eup %2234  ;;  %v1015_v20 = vsel %vm3194_vm8, %v3186_v34, %v1009_v41 }
 0x1af   : > { %v3244_v31 = vadd.f32 %v871_v24, %v3678_v35  ;;  %v920_v17 = vmul.f32 -0.5, %v3177_v28  ;;  %v1243_v58 = vsel %vm1173_vm3, %v1164_v6, 0.0  ;;  %v1944_v30 = vadd.f32 -0.6931472, %v3043_v29 }
 0x1b0   : > { %v1240_v45 = vsel %vm1173_vm3, %v1163_v50, 0.0  ;;  %v1146_v2 = vmul.f32 %v3102_v21, %v1928_v42  ;;  %v1145_v61 = vmul.f32 %v3102_v21, %v1927_v32  ;;  %v1943_v10 = vadd.f32 -0.6931472, %v2988_v62  ;;  %v2237_v39 = vpop.eup %2236  ;;  %1244 = vadd.xlane.f32.xlu1 %v1243_v58 }
 0x1b1   : > { %v3267_v14 = vmul.f32 %v3201_v55, %v894_v23  ;;  %v1034_v34 = vadd.f32 1.0, %v3234_v22  ;;  %v1037_v56 = vmul.f32 -0.5, %v3234_v22  ;;  %v923_v48 = vand.u32 2147483647, %v3177_v28  ;;  %1241 = vadd.xlane.f32.xlu0 %v1240_v45 }
 0x1b2   : > { %vm3272_vm10 = vcmp.lt.f32.partialorder %v1058_v9, 0.0004427343  ;;  %v1040_v46 = vand.u32 2147483647, %v3234_v22  ;;  %v1064_v62 = vmul.f32 -0.5, %v3209_v25  ;;  %2246 = vlog2.f32 %v899_v60  ;;  %v2239_v27 = vpop.eup %2238 }
 0x1b3   : > { %v1043_v55 = vadd.f32 1.0, %v3254_v26  ;;  %v3683_v4 = vmax.f32 %v2973_v15, 0.0  ;;  %v921_v54 = vadd.f32 1.0, %v920_v17  ;;  %v1162_v11 = vmul.f32 %v3102_v21, %v1944_v30 }
 0x1b4   : > { %v1934_v59 = vadd.f32 -0.6931472, %v3181_v38  ;;  %v2241_v47 = vpop.eup %2240  ;;  %v1189_v13 = vsel %vm1173_vm3, %v1146_v2, 0.0  ;;  %v1186_v24 = vsel %vm1173_vm3, %v1145_v61, 0.0  ;;  %v1161_v41 = vmul.f32 %v3102_v21, %v1943_v10 }
 0x1b5   : > { %v3281_v37 = vadd.f32 %v1015_v20, %v3683_v4  ;;  %v1933_v8 = vadd.f32 -0.6931472, %v3048_v3  ;;  %v910_v6 = vmul.f32 0.6931472, %v2237_v39  ;;  %2248 = vlog2.f32 %v1034_v34  ;;  %1190 = vadd.xlane.f32.xlu1 %v1189_v13  ;;  %1187 = vadd.xlane.f32.xlu0 %v1186_v24 }
 0x1b6   : > { %v3289_v53 = vadd.f32 1.0, %v1037_v56  ;;  %vm3291_vm11 = vcmp.lt.f32.partialorder %v923_v48, 0.0004427343  ;;  %vm3295_vm12 = vcmp.lt.f32.partialorder %v896_v43, 0.0004427343  ;;  %v1065_v50 = vadd.f32 1.0, %v1064_v62  ;;  %v2243_v3 = vpop.eup %2242 }
 0x1b7   : > { %v1067_v42 = vand.u32 2147483647, %v3209_v25  ;;  %v902_v32 = vmul.f32 -0.5, %v3227_v33  ;;  %2250 = vlog2.f32 %v1043_v55  ;;  %v919_v9 = vmul.f32 0.6931472, %v2241_v47 }
 0x1b8   : > { %v922_v23 = vmul.f32 %v3177_v28, %v921_v54  ;;  %v1237_v35 = vsel %vm1173_vm3, %v1162_v11, 0.0  ;;  %v1950_v60 = vadd.f32 -0.6931472, %v3215_v36  ;;  %v2245_v20 = vpop.eup %2244  ;;  %v1234_v43 = vsel %vm1173_vm3, %v1161_v41, 0.0 }
 0x1b9   : > { %v1152_v17 = vmul.f32 %v3102_v21, %v1934_v59  ;;  %v1151_v58 = vmul.f32 %v3102_v21, %v1933_v8  ;;  %v1949_v30 = vadd.f32 -0.6931472, %v3096_v12  ;;  %v916_v45 = vsel %vm3246_vm9, %v3224_v40, %v910_v6  ;;  %1238 = vadd.xlane.f32.xlu1 %v1237_v35  ;;  %1235 = vadd.xlane.f32.xlu0 %v1234_v43 }
 0x1ba   : > { %v1054_v2 = vmul.f32 0.6931472, %v2239_v27  ;;  %v905_v28 = vand.u32 2147483647, %v3227_v33  ;;  %v1066_v36 = vmul.f32 %v3209_v25, %v1065_v50  ;;  %vm3313_vm13 = vcmp.lt.f32.partialorder %v1067_v42, 0.0004427343 }
 0x1bb   : > { %v903_v10 = vadd.f32 1.0, %v902_v32  ;;  %v1046_v39 = vmul.f32 -0.5, %v3254_v26  ;;  %v2353_v34 = vmov 0   ;;  %v925_v12 = vsel %vm3291_vm11, %v922_v23, %v919_v9 }
 0x1bc   : > { %2099 = vset.pattern.permute.xlu0 %v2353_v34  ;;  %2098 = vset.pattern.permute.xlu1 %v2353_v34  ;;  %v1063_v40 = vmul.f32 0.6931472, %v2245_v20  ;;  %v1168_v18 = vmul.f32 %v3102_v21, %v1950_v60  ;;  %v1932_v56 = vadd.f32 -0.6931472, %v3244_v31  ;;  %v2247_v48 = vpop.eup %2246  ;;  %v1207_v25 = vsel %vm1173_vm3, %v1152_v17, 0.0 }
 0x1bd   : > { %v1204_v62 = vsel %vm1173_vm3, %v1151_v58, 0.0  ;;  %v1167_v55 = vmul.f32 %v3102_v21, %v1949_v30  ;;  %v1931_v27 = vadd.f32 -0.6931472, %v3144_v19  ;;  %v3690_v4 = vmax.f32 %v2993_v0, 0.0  ;;  %1208 = vadd.xlane.f32.xlu1 %v1207_v25  ;;  %v3378_v30 = vpop.permute.xlu1 %1281 }
 0x1be   : > { %v1060_v11 = vsel %vm3272_vm10, %v3251_v52, %v1054_v2  ;;  %v892_v59 = vmul.f32 0.6931472, %v2243_v3  ;;  %vm3331_vm14 = vcmp.lt.f32.partialorder %v905_v28, 0.0004427343  ;;  %1205 = vadd.xlane.f32.xlu0 %v1204_v62  ;;  %v3693_v31 = vmax.f32 %v3039_v51, 0.0 }
 0x1bf   : > { %v1084_v54 = vadd.f32 %v916_v45, %v3690_v4  ;;  %v904_v24 = vmul.f32 %v3227_v33, %v903_v10  ;;  %v1047_v19 = vadd.f32 1.0, %v1046_v39  ;;  %v1049_v0 = vand.u32 2147483647, %v3254_v26  ;;  %v2249_v41 = vpop.eup %2248 }
 0x1c0   : > { %v1085_v13 = vadd.f32 %v925_v12, %v3693_v31  ;;  %v1069_v29 = vsel %vm3313_vm13, %v1066_v36, %v1063_v40  ;;  %v901_v52 = vmul.f32 0.6931472, %v2247_v48  ;;  %v1255_v8 = vsel %vm1173_vm3, %v1168_v18, 0.0 }
 0x1c1   : > { %v1150_v6 = vmul.f32 %v3102_v21, %v1932_v56  ;;  %v2251_v15 = vpop.eup %2250  ;;  %v1252_v50 = vsel %vm1173_vm3, %v1167_v55, 0.0  ;;  %v1149_v51 = vmul.f32 %v3102_v21, %v1931_v27  ;;  %v1948_v42 = vadd.f32 -0.6931472, %v3281_v37  ;;  %1256 = vadd.xlane.f32.xlu1 %v1255_v8  ;;  %v1286_v48 = vpop.permute.xlu1 %1285 }
 0x1c2   : > { %v1947_v33 = vadd.f32 -0.6931472, %v3174_v49  ;;  %v3694_v32 = vmax.f32 %v3034_v63, 0.0  ;;  %v898_v9 = vsel %vm3295_vm12, %v3267_v14, %v892_v59  ;;  %v1039_v23 = vmul.f32 %v3234_v22, %v3289_v53  ;;  %1253 = vadd.xlane.f32.xlu0 %v1252_v50 }
 0x1c3   : > { %vm3356_vm15 = vcmp.lt.f32.partialorder %v1040_v46, 0.0004427343  ;;  %v1036_v37 = vmul.f32 0.6931472, %v2249_v41  ;;  %v1101_v63 = vadd.f32 %v1069_v29, %v653_v1  ;;  %v1048_v49 = vmul.f32 %v3254_v26, %v1047_v19 }
 0x1c4   : > { %v1100_v3 = vadd.f32 %v1060_v11, %v3694_v32  ;;  %vm3363_vm0 = vcmp.lt.f32.partialorder %v1049_v0, 0.0004427343  ;;  %v907_v14 = vsel %vm3331_vm14, %v904_v24, %v901_v52  ;;  %v1045_v22 = vmul.f32 0.6931472, %v2251_v15 }
 0x1c5   : > { %v1201_v46 = vsel %vm1173_vm3, %v1150_v6, 0.0  ;;  %v1938_v53 = vadd.f32 -0.6931472, %v1085_v13  ;;  %v1198_v60 = vsel %vm1173_vm3, %v1149_v51, 0.0  ;;  %v1166_v20 = vmul.f32 %v3102_v21, %v1948_v42  ;;  %v1290_v31 = vpop.permute.xlu1 %1289 }
 0x1c6   : > { %v1165_v5 = vmul.f32 %v3102_v21, %v1947_v33  ;;  %v1937_v1 = vadd.f32 -0.6931472, %v1084_v54  ;;  %v635_v26 = vmax.f32 %v3081_v57, 0.0  ;;  %1202 = vadd.xlane.f32.xlu1 %v1201_v46  ;;  %1199 = vadd.xlane.f32.xlu0 %v1198_v60  ;;  %v3699_v43 = vmax.f32 %v3055_v7, 0.0 }
 0x1c7   : > { %v1042_v58 = vsel %vm3356_vm15, %v1039_v23, %v1036_v37  ;;  %v1051_v2 = vsel %vm3363_vm0, %v1048_v49, %v1045_v22  ;;  %v1156_v28 = vmul.f32 %v3102_v21, %v1938_v53  ;;  %v1954_v36 = vadd.f32 -0.6931472, %v1101_v63 }
 0x1c8   : > { %v1082_v17 = vadd.f32 %v898_v9, %v3699_v43  ;;  %v1083_v45 = vadd.f32 %v907_v14, %v635_v26  ;;  %v1249_v61 = vsel %vm1173_vm3, %v1166_v20, 0.0  ;;  %v1246_v57 = vsel %vm1173_vm3, %v1165_v5, 0.0 }
 0x1c9   : > { %v1155_v10 = vmul.f32 %v3102_v21, %v1937_v1  ;;  %v1953_v7 = vadd.f32 -0.6931472, %v1100_v3  ;;  %v650_v39 = vmax.f32 %v3090_v16, 0.0  ;;  %v651_v34 = vmax.f32 %v3118_v44, 0.0  ;;  %v1278_v16 = vpop.permute.xlu0 %1277  ;;  %v3402_v29 = vpop.permute.xlu1 %1297 }
 0x1ca   : > { %1250 = vadd.xlane.f32.xlu1 %v1249_v61  ;;  %1247 = vadd.xlane.f32.xlu0 %v1246_v57  ;;  %v1219_v18 = vsel %vm1173_vm3, %v1156_v28, 0.0  ;;  %v1936_v56 = vadd.f32 -0.6931472, %v1083_v45  ;;  %v1172_v62 = vmul.f32 %v3102_v21, %v1954_v36  ;;  %v1935_v27 = vadd.f32 -0.6931472, %v1082_v17 }
 0x1cb   : > { %v1098_v12 = vadd.f32 %v1042_v58, %v650_v39  ;;  %v1099_v40 = vadd.f32 %v1051_v2, %v651_v34  ;;  %v1216_v25 = vsel %vm1173_vm3, %v1155_v10, 0.0  ;;  %v1171_v55 = vmul.f32 %v3102_v21, %v1953_v7 }
 0x1cc   : > { %v1154_v44 = vmul.f32 %v3102_v21, %v1936_v56  ;;  %v1267_v54 = vsel %vm1173_vm3, %v1172_v62, 0.0  ;;  %v1153_v59 = vmul.f32 %v3102_v21, %v1935_v27  ;;  %vm1609_vm1 = vcmask 130112  }
 0x1cd   : > { %v1952_v4 = vadd.f32 -0.6931472, %v1099_v40  ;;  %v1264_v11 = vsel %vm1173_vm3, %v1171_v55, 0.0  ;;  %v1951_v47 = vadd.f32 -0.6931472, %v1098_v12  ;;  %v3400_v41 = vpop.permute.xlu0 %1293  ;;  %v3406_v15 = vpop.permute.xlu1 %1305  ;;  %vm1616_vm2 = vcmask 195712  }
 0x1ce   : > { %1220 = vadd.xlane.f32.xlu1 %v1219_v18  ;;  %1217 = vadd.xlane.f32.xlu0 %v1216_v25  ;;  %v1213_v13 = vsel %vm1173_vm3, %v1154_v44, 0.0  ;;  %v1210_v24 = vsel %vm1173_vm3, %v1153_v59, 0.0  ;;  %vm1630_vm4 = vcmask 326912   ;;  %vm1637_vm5 = vcmask 392512  }
 0x1cf   : > { %v1170_v19 = vmul.f32 %v3102_v21, %v1952_v4  ;;  %v1169_v0 = vmul.f32 %v3102_v21, %v1951_v47  ;;  %vm1644_vm6 = vcmask 458112   ;;  %vm1651_vm7 = vcmask 523712  }
 0x1d0   : > { %vm1658_vm8 = vcmask 589312   ;;  %vm1665_vm9 = vcmask 654912   ;;  %vm1672_vm10 = vcmask 720512   ;;  %vm1679_vm11 = vcmask 786112  }
 0x1d1   : > { %v1261_v52 = vsel %vm1173_vm3, %v1170_v19, 0.0  ;;  %v1258_v8 = vsel %vm1173_vm3, %v1169_v0, 0.0  ;;  %v1302_v6 = vpop.permute.xlu0 %1301  ;;  %v3410_v51 = vpop.permute.xlu1 %1313  ;;  %vm1623_vm3 = vcmask 261312   ;;  %vm1686_vm12 = vcmask 851712  }
 0x1d2   : > { %1268 = vadd.xlane.f32.xlu1 %v1267_v54  ;;  %1265 = vadd.xlane.f32.xlu0 %v1264_v11  ;;  %vm1693_vm13 = vcmask 917312   ;;  %vm1700_vm14 = vcmask 982912   ;;  %vm1707_vm15 = vcmask 1048512   ;;  %vm1788_vm0 = vcmask 1041409  }
 0x1d5   : > { %v3408_v50 = vpop.permute.xlu0 %1309  ;;  %v3414_v42 = vpop.permute.xlu1 %1321 }
 0x1d6   : > { %1214 = vadd.xlane.f32.xlu1 %v1213_v13  ;;  %1211 = vadd.xlane.f32.xlu0 %v1210_v24 }
 0x1d9   : > { %v3412_v21 = vpop.permute.xlu0 %1317  ;;  %v3418_v32 = vpop.permute.xlu1 %1329 }
 0x1da   : > { %1262 = vadd.xlane.f32.xlu1 %v1261_v52  ;;  %1259 = vadd.xlane.f32.xlu0 %v1258_v8 }
 0x1dd   : > { %v3416_v33 = vpop.permute.xlu0 %1325  ;;  %v3422_v9 = vpop.permute.xlu1 %1337 }
 0x1e1   : > { %v3420_v3 = vpop.permute.xlu0 %1333  ;;  %v1349_v35 = vpop.permute.xlu1 %1348 }
 0x1e5   : > { %v1345_v23 = vpop.permute.xlu0 %1344  ;;  %v1357_v63 = vpop.permute.xlu1 %1356 }
 0x1e9   : > { %v1353_v37 = vpop.permute.xlu0 %1352  ;;  %v1365_v38 = vpop.permute.xlu1 %1364 }
 0x1ed   : > { %v1361_v49 = vpop.permute.xlu0 %1360  ;;  %v1373_v22 = vpop.permute.xlu1 %1372 }
 0x1f1   : > { %v1369_v14 = vpop.permute.xlu0 %1368  ;;  %v3426_v53 = vpop.permute.xlu1 %1380 }
 0x1f5   : > { %v3424_v46 = vpop.permute.xlu0 %1376  ;;  %v3428_v20 = vpop.permute.xlu1 %1388 }
 0x1f9   : > { %v1385_v60 = vpop.permute.xlu0 %1384  ;;  %v3432_v1 = vpop.permute.xlu1 %1396 }
 0x1fd   : > { %v3430_v5 = vpop.permute.xlu0 %1392  ;;  %v3436_v43 = vpop.permute.xlu1 %1404 }
 0x201   : > { %v3434_v26 = vpop.permute.xlu0 %1400 }
 0x225   : > { %v1230_v17 = vpop.xlane.xlu0 %1229 }
 0x226   : > { %v1456_v58 = vadd.f32 %v1353_v37, %v1230_v17 }
 0x228   : > { %v1182_v45 = vpop.xlane.xlu1 %1181  ;;  %1557 = vperm.xlu0 %2099, %v1456_v58  }
 0x229   : > { %v1440_v2 = vadd.f32 %v1286_v48, %v1182_v45 }
 0x22b   : > { %1509 = vperm.xlu1 %2098, %v1440_v2  }
 0x22c   : > { %v1185_v28 = vpop.xlane.xlu1 %1184  ;;  %v1176_v36 = vpop.xlane.xlu0 %1175 }
 0x22d   : > { %v1438_v61 = vadd.f32 %v1278_v16, %v1176_v36  ;;  %v1441_v40 = vadd.f32 %v1290_v31, %v1185_v28 }
 0x22f   : > { %1503 = vperm.xlu0 %2099, %v1438_v61  }
 0x231   : > { %v1233_v57 = vpop.xlane.xlu1 %1232  ;;  %v1224_v10 = vpop.xlane.xlu0 %1223 }
 0x232   : > { %v1457_v7 = vadd.f32 %v1357_v63, %v1233_v57  ;;  %v1454_v39 = vadd.f32 %v1345_v23, %v1224_v10 }
 0x234   : > { %1560 = vperm.xlu1 %2098, %v1457_v7   ;;  %1551 = vperm.xlu0 %2099, %v1454_v39  }
 0x235   : > { %v1227_v34 = vpop.xlane.xlu1 %1226  ;;  %v1179_v12 = vpop.xlane.xlu0 %1178 }
 0x236   : > { %v1439_v18 = vadd.f32 %v3378_v30, %v1179_v12  ;;  %v1455_v25 = vadd.f32 %v1349_v35, %v1227_v34 }
 0x238   : > { %1512 = vperm.xlu0 %2099, %v1441_v40   ;;  %1506 = vperm.xlu1 %2098, %v1439_v18  }
 0x239   : > { %v1197_v56 = vpop.xlane.xlu1 %1196  ;;  %v1194_v48 = vpop.xlane.xlu0 %1193 }
 0x23a   : > { %v1444_v27 = vadd.f32 %v1302_v6, %v1194_v48  ;;  %v1445_v24 = vadd.f32 %v3406_v15, %v1197_v56  ;;  %v3701_v48 = vld [vmem:[#allocation8_spill] sm:$0xff] }
 0x23c   : > { %1554 = vperm.xlu1 %2098, %v1455_v25  }
 0x23d   : > { %v1245_v62 = vpop.xlane.xlu1 %1244 }
 0x23e   : > { %v1242_v55 = vpop.xlane.xlu0 %1241  ;;  %v1461_v30 = vadd.f32 %v1373_v22, %v1245_v62 }
 0x23f   : > { %v1460_v16 = vadd.f32 %v1369_v14, %v1242_v55 }
 0x240   : > { %1521 = vperm.xlu1 %2098, %v1444_v27  }
 0x241   : > { %1569 = vperm.xlu0 %2099, %v1460_v16  }
 0x242   : > { %v1191_v44 = vpop.xlane.xlu1 %1190  ;;  %v1188_v4 = vpop.xlane.xlu0 %1187 }
 0x243   : > { %v1442_v54 = vadd.f32 %v3400_v41, %v1188_v4  ;;  %v1443_v8 = vadd.f32 %v3402_v29, %v1191_v44 }
 0x245   : > { %1515 = vperm.xlu1 %2098, %v1442_v54  }
 0x246   : > { %v1239_v11 = vpop.xlane.xlu1 %1238  ;;  %v1236_v59 = vpop.xlane.xlu0 %1235 }
 0x247   : > { %v1458_v47 = vadd.f32 %v1361_v49, %v1236_v59  ;;  %v1459_v19 = vadd.f32 %v1365_v38, %v1239_v11 }
 0x249   : > { %1572 = vperm.xlu1 %2098, %v1461_v30   ;;  %1563 = vperm.xlu0 %2099, %v1458_v47  }
 0x24a   : > { %v1209_v31 = vpop.xlane.xlu1 %1208 }
 0x24b   : > { %v1206_v13 = vpop.xlane.xlu0 %1205  ;;  %v1449_v49 = vadd.f32 %v3414_v42, %v1209_v31 }
 0x24c   : > { %v1448_v41 = vadd.f32 %v3412_v21, %v1206_v13 }
 0x24d   : > { %1566 = vperm.xlu1 %2098, %v1459_v19   ;;  %1524 = vperm.xlu0 %2099, %v1445_v24  }
 0x24e   : > { %v1257_v0 = vpop.xlane.xlu1 %1256 }
 0x24f   : > { %v1254_v52 = vpop.xlane.xlu0 %1253  ;;  %v1465_v21 = vadd.f32 %v3428_v20, %v1257_v0 }
 0x250   : > { %v1464_v35 = vadd.f32 %v1385_v60, %v1254_v52 }
 0x251   : > { %1518 = vperm.xlu0 %2099, %v1443_v8   ;;  %1533 = vperm.xlu1 %2098, %v1448_v41  }
 0x253   : > { %v1203_v6 = vpop.xlane.xlu1 %1202  ;;  %v1200_v23 = vpop.xlane.xlu0 %1199 }
 0x254   : > { %v1446_v37 = vadd.f32 %v3408_v50, %v1200_v23  ;;  %v1447_v17 = vadd.f32 %v3410_v51, %v1203_v6 }
 0x255   : > { %1581 = vperm.xlu0 %2099, %v1464_v35  }
 0x256   : > { %1527 = vperm.xlu1 %2098, %v1446_v37  }
 0x257   : > { %v1251_v63 = vpop.xlane.xlu1 %1250  ;;  %v1248_v15 = vpop.xlane.xlu0 %1247 }
 0x258   : > { %v1462_v38 = vadd.f32 %v3424_v46, %v1248_v15  ;;  %v1463_v22 = vadd.f32 %v3426_v53, %v1251_v63 }
 0x25a   : > { %1536 = vperm.xlu1 %2098, %v1449_v49   ;;  %1575 = vperm.xlu0 %2099, %v1462_v38  }
 0x25b   : > { %v1221_v29 = vpop.xlane.xlu1 %1220  ;;  %v1218_v14 = vpop.xlane.xlu0 %1217 }
 0x25c   : > { %v1452_v58 = vadd.f32 %v3420_v3, %v1218_v14  ;;  %v1453_v51 = vadd.f32 %v3422_v9, %v1221_v29 }
 0x25e   : > { %1578 = vperm.xlu1 %2098, %v1463_v22   ;;  %1584 = vperm.xlu0 %2099, %v1465_v21  }
 0x25f   : > { %v1269_v60 = vpop.xlane.xlu1 %1268  ;;  %v1266_v50 = vpop.xlane.xlu0 %1265 }
 0x260   : > { %v1468_v45 = vadd.f32 %v3434_v26, %v1266_v50  ;;  %v1469_v26 = vadd.f32 %v3436_v43, %v1269_v60 }
 0x262   : > { %1530 = vperm.xlu0 %2099, %v1447_v17   ;;  %1545 = vperm.xlu1 %2098, %v1452_v58  }
 0x263   : > { %v1215_v42 = vpop.xlane.xlu1 %1214  ;;  %v1212_v46 = vpop.xlane.xlu0 %1211 }
 0x264   : > { %v1450_v2 = vadd.f32 %v3416_v33, %v1212_v46  ;;  %v1451_v53 = vadd.f32 %v3418_v32, %v1215_v42 }
 0x266   : > { %1593 = vperm.xlu0 %2099, %v1468_v45   ;;  %1539 = vperm.xlu1 %2098, %v1450_v2  }
 0x267   : > { %v1260_v20 = vpop.xlane.xlu0 %1259  ;;  %v1263_v36 = vpop.xlane.xlu1 %1262 }
 0x268   : > { %v1466_v28 = vadd.f32 %v3430_v5, %v1260_v20  ;;  %v1467_v3 = vadd.f32 %v3432_v1, %v1263_v36  ;;  %v3700_v1 = vlaneseq }
 0x26a   : > { %1542 = vperm.xlu1 %2098, %v1451_v53   ;;  %1587 = vperm.xlu0 %2099, %v1466_v28   ;;  %v3464_v40 = vand.u32 127, %v3700_v1 }
 0x26c   : > { %v1604_v43 = vadd.s32 4294967288, %v3464_v40  ;;  %v1611_v62 = vadd.s32 4294967280, %v3464_v40  ;;  %v1602_v16 = vsub.s32 %v3464_v40, %v3701_v48  ;;  %v1625_v44 = vadd.s32 4294967264, %v3464_v40 }
 0x26d   : > { %v1618_v47 = vadd.s32 4294967272, %v3464_v40  ;;  %v1632_v31 = vadd.s32 4294967256, %v3464_v40  ;;  %v1639_v52 = vadd.s32 4294967248, %v3464_v40  ;;  %v1653_v21 = vadd.s32 4294967232, %v3464_v40 }
 0x26e   : > { %1548 = vperm.xlu1 %2098, %v1453_v51   ;;  %1590 = vperm.xlu0 %2099, %v1467_v3   ;;  %v1607_v25 = vsub.s32 %v1604_v43, %v3701_v48  ;;  %v1614_v54 = vsub.s32 %v1611_v62, %v3701_v48  ;;  %v1628_v13 = vsub.s32 %v1625_v44, %v3701_v48  ;;  %v1646_v17 = vadd.s32 4294967240, %v3464_v40 }
 0x26f   : > { %v1621_v6 = vsub.s32 %v1618_v47, %v3701_v48  ;;  %v1635_v35 = vsub.s32 %v1632_v31, %v3701_v48  ;;  %v1642_v14 = vsub.s32 %v1639_v52, %v3701_v48  ;;  %v1660_v53 = vadd.s32 4294967224, %v3464_v40 }
 0x270   : > { %v1656_v36 = vsub.s32 %v1653_v21, %v3701_v48 }
 0x272   : > { %1596 = vperm.xlu0 %2099, %v1469_v26   ;;  %v1649_v26 = vsub.s32 %v1646_v17, %v3701_v48 }
 0x2a7   : > { %v1558_v33 = vpop.permute.xlu0 %1557 }
 0x2a8   : > { %v1721_v29 = vrot.slane %v1558_v33, %v1614_v54 }
 0x2aa   : > { %v1510_v61 = vpop.permute.xlu1 %1509 }
 0x2ab   : > { %v1615_v0 = vrot.slane %v1510_v61, %v1614_v54 }
 0x2ae   : > { %v1504_v57 = vpop.permute.xlu0 %1503 }
 0x2af   : > { %v1603_v30 = vrot.slane %v1504_v57, %v1602_v16  ;;  %v1667_v57 = vadd.s32 4294967216, %v3464_v40 }
 0x2b3   : > { %v3457_v10 = vpop.permute.xlu1 %1560  ;;  %v1552_v7 = vpop.permute.xlu0 %1551 }
 0x2b4   : > { %v1712_v23 = vrot.slane %v1552_v7, %v1602_v16  ;;  %v1726_v45 = vrot.slane %v3457_v10, %v1621_v6  ;;  %v1681_v16 = vadd.s32 4294967200, %v3464_v40 }
 0x2b7   : > { %v1507_v32 = vpop.permute.xlu1 %1506  ;;  %v1513_v39 = vpop.permute.xlu0 %1512 }
 0x2b8   : > { %v1608_v4 = vrot.slane %v1507_v32, %v1607_v25  ;;  %v1622_v15 = vrot.slane %v1513_v39, %v1621_v6 }
 0x2ba   : > { %v1610_v24 = vsel %vm1609_vm1, %v1608_v4, %v1603_v30  ;;  %v1688_v4 = vadd.s32 4294967192, %v3464_v40 }
 0x2bb   : > { %v1555_v5 = vpop.permute.xlu1 %1554  ;;  %v1617_v37 = vsel %vm1616_vm2, %v1615_v0, %v1610_v24  ;;  %v1684_v0 = vsub.s32 %v1681_v16, %v3701_v48 }
 0x2bc   : > { %v1716_v19 = vrot.slane %v1555_v5, %v1607_v25  ;;  %v1624_v50 = vsel %vm1623_vm3, %v1622_v15, %v1617_v37  ;;  %v1663_v5 = vsub.s32 %v1660_v53, %v3701_v48  ;;  %v1691_v52 = vsub.s32 %v1688_v4, %v3701_v48 }
 0x2be   : > { %v1717_v49 = vsel %vm1609_vm1, %v1716_v19, %v1712_v23  ;;  %v1695_v23 = vadd.s32 4294967184, %v3464_v40 }
 0x2bf   : > { %v3459_v34 = vpop.permute.xlu1 %1521  ;;  %v1722_v58 = vsel %vm1616_vm2, %v1721_v29, %v1717_v49 }
 0x2c0   : > { %v3461_v12 = vpop.permute.xlu0 %1569  ;;  %v1643_v28 = vrot.slane %v3459_v34, %v1642_v14  ;;  %v1727_v33 = vsel %vm1623_vm3, %v1726_v45, %v1722_v58 }
 0x2c1   : > { %v1741_v39 = vrot.slane %v3461_v12, %v1642_v14 }
 0x2c4   : > { %v1516_v9 = vpop.permute.xlu1 %1515 }
 0x2c5   : > { %v1629_v63 = vrot.slane %v1516_v9, %v1628_v13 }
 0x2c7   : > { %v1631_v42 = vsel %vm1630_vm4, %v1629_v63, %v1624_v50 }
 0x2c8   : > { %v3467_v18 = vpop.permute.xlu1 %1572  ;;  %v1564_v56 = vpop.permute.xlu0 %1563 }
 0x2c9   : > { %v1731_v46 = vrot.slane %v1564_v56, %v1628_v13  ;;  %v1674_v56 = vadd.s32 4294967208, %v3464_v40  ;;  %v1746_v12 = vrot.slane %v3467_v18, %v1649_v26 }
 0x2cb   : > { %v1732_v61 = vsel %vm1630_vm4, %v1731_v46, %v1727_v33  ;;  %v1677_v47 = vsub.s32 %v1674_v56, %v3701_v48 }
 0x2cc   : > { %v1567_v55 = vpop.permute.xlu1 %1566  ;;  %v3471_v27 = vpop.permute.xlu0 %1524 }
 0x2cd   : > { %v1736_v2 = vrot.slane %v1567_v55, %v1635_v35  ;;  %v1650_v7 = vrot.slane %v3471_v27, %v1649_v26  ;;  %v1670_v55 = vsub.s32 %v1667_v57, %v3701_v48 }
 0x2cf   : > { %v1737_v32 = vsel %vm1637_vm5, %v1736_v2, %v1732_v61 }
 0x2d0   : > { %v3477_v11 = vpop.permute.xlu1 %1533  ;;  %v1519_v59 = vpop.permute.xlu0 %1518  ;;  %v1742_v62 = vsel %vm1644_vm6, %v1741_v39, %v1737_v32 }
 0x2d1   : > { %v1636_v38 = vrot.slane %v1519_v59, %v1635_v35  ;;  %v1747_v31 = vsel %vm1651_vm7, %v1746_v12, %v1742_v62  ;;  %v1671_v24 = vrot.slane %v3477_v11, %v1670_v55 }
 0x2d3   : > { %v1638_v20 = vsel %vm1637_vm5, %v1636_v38, %v1631_v42 }
 0x2d4   : > { %v3484_v41 = vpop.permute.xlu0 %1581  ;;  %v1645_v10 = vsel %vm1644_vm6, %v1643_v28, %v1638_v20 }
 0x2d5   : > { %v1528_v8 = vpop.permute.xlu1 %1527  ;;  %v1652_v43 = vsel %vm1651_vm7, %v1650_v7, %v1645_v10  ;;  %v1761_v6 = vrot.slane %v3484_v41, %v1670_v55  ;;  %v1698_v41 = vsub.s32 %v1695_v23, %v3701_v48 }
 0x2d6   : > { %v1657_v34 = vrot.slane %v1528_v8, %v1656_v36  ;;  %v1702_v8 = vadd.s32 4294967176, %v3464_v40 }
 0x2d8   : > { %v1659_v54 = vsel %vm1658_vm8, %v1657_v34, %v1652_v43 }
 0x2d9   : > { %v3492_v22 = vpop.permute.xlu1 %1536  ;;  %v1576_v60 = vpop.permute.xlu0 %1575 }
 0x2da   : > { %v1751_v27 = vrot.slane %v1576_v60, %v1656_v36  ;;  %v1678_v11 = vrot.slane %v3492_v22, %v1677_v47  ;;  %v1705_v60 = vsub.s32 %v1702_v8, %v3701_v48 }
 0x2dc   : > { %v1752_v19 = vsel %vm1658_vm8, %v1751_v27, %v1747_v31 }
 0x2dd   : > { %v1579_v51 = vpop.permute.xlu1 %1578  ;;  %v1585_v3 = vpop.permute.xlu0 %1584 }
 0x2de   : > { %v1756_v44 = vrot.slane %v1579_v51, %v1663_v5  ;;  %v1766_v29 = vrot.slane %v1585_v3, %v1677_v47 }
 0x2e0   : > { %v1757_v18 = vsel %vm1665_vm9, %v1756_v44, %v1752_v19 }
 0x2e1   : > { %v3510_v9 = vpop.permute.xlu1 %1545  ;;  %v1531_v1 = vpop.permute.xlu0 %1530  ;;  %v1762_v15 = vsel %vm1672_vm10, %v1761_v6, %v1757_v18 }
 0x2e2   : > { %v1664_v25 = vrot.slane %v1531_v1, %v1663_v5  ;;  %v1767_v17 = vsel %vm1679_vm11, %v1766_v29, %v1762_v15  ;;  %v1699_v20 = vrot.slane %v3510_v9, %v1698_v41 }
 0x2e4   : > { %v1666_v13 = vsel %vm1665_vm9, %v1664_v25, %v1659_v54 }
 0x2e5   : > { %v1540_v59 = vpop.permute.xlu1 %1539  ;;  %v1594_v30 = vpop.permute.xlu0 %1593  ;;  %v1673_v35 = vsel %vm1672_vm10, %v1671_v24, %v1666_v13 }
 0x2e6   : > { %v1685_v49 = vrot.slane %v1540_v59, %v1684_v0  ;;  %v1680_v14 = vsel %vm1679_vm11, %v1678_v11, %v1673_v35  ;;  %v1781_v53 = vrot.slane %v1594_v30, %v1698_v41 }
 0x2e8   : > { %v1687_v22 = vsel %vm1686_vm12, %v1685_v49, %v1680_v14 }
 0x2e9   : > { %v1543_v37 = vpop.permute.xlu1 %1542  ;;  %v1588_v63 = vpop.permute.xlu0 %1587 }
 0x2ea   : > { %v1771_v38 = vrot.slane %v1588_v63, %v1684_v0  ;;  %v1692_v21 = vrot.slane %v1543_v37, %v1691_v52 }
 0x2ec   : > { %v1772_v42 = vsel %vm1686_vm12, %v1771_v38, %v1767_v17  ;;  %v1694_v46 = vsel %vm1693_vm13, %v1692_v21, %v1687_v22 }
 0x2ed   : > { %v1549_v40 = vpop.permute.xlu1 %1548  ;;  %v1591_v50 = vpop.permute.xlu0 %1590  ;;  %v1701_v36 = vsel %vm1700_vm14, %v1699_v20, %v1694_v46 }
 0x2ee   : > { %v1776_v58 = vrot.slane %v1591_v50, %v1691_v52  ;;  %v1706_v45 = vrot.slane %v1549_v40, %v1705_v60 }
 0x2f0   : > { %v1777_v2 = vsel %vm1693_vm13, %v1776_v58, %v1772_v42  ;;  %v1708_v3 = vsel %vm1707_vm15, %v1706_v45, %v1701_v36 }
 0x2f1   : > { %v1597_v28 = vpop.permute.xlu0 %1596  ;;  %v1782_v51 = vsel %vm1700_vm14, %v1781_v53, %v1777_v2 }
 0x2f2   : > { %v1786_v48 = vrot.slane %v1597_v28, %v1705_v60 }
 0x2f4   : > { %v1787_v26 = vsel %vm1707_vm15, %v1786_v48, %v1782_v51 }
 0x2f5   : > { %v1789_v33 = vsel %vm1788_vm0, %v1787_v26, %v1708_v3 }
 0x2f6   : > { %1791 = vst [vmem:[%s255_s25] sm:$0x3] %v1789_v33 }
 0x2f7   : > { %2295 = shalt.err (!%p2292_p3)
}
 0x2f8   : > { %s2296_s23 = scalar_lea.hbm %s3538_s15, 32  ;;  %s2300_s10 = scalar_lea.hbm %s3586_s5, 128 }
 0x2f9   : > { %p2297_p4 = scmp.ne.s32.totalorder %s3538_s15, %s2296_s23  ;;  %p2301_p2 = scmp.lt.u32.totalorder %s3538_s15, %s3586_s5 }
 0x2fa   : > { %p2302_p7 = scmp.lt.u32.totalorder %s2300_s10, %s2296_s23  ;;  %p2304_p10 = scmp.lt.u32.totalorder %s2296_s23, %s3538_s15 }
 0x2fb   : > { %p2298_p5 = pnand %p2297_p4, %p3702_p11 }
 0x2fc   : > { %p2303_p6 = por %p2302_p7, %p2301_p2 }
 0x2fd   : > { %p2299_p0 = pneg %p2298_p5 }
 0x2fe   : > { %p2305_p12 = por %p2304_p10, %p2303_p6 }
 0x300   : > { %p2306_p8 = pnand %p2305_p12, %p2299_p0 }
 0x302   : > { %2309 = shalt.err (!%p2306_p8)
}
 0x303   : > { %2051 = dma.vmem_to_hbm [thread:$0]  (%p3702_p11), %s3540_s26, 32, %s3538_s15, %s1793_s22  }
 0x304 PF: > { %p2062_p9 = scmp.ge.s32.totalorder %s2348_s21, 2  ;;  %s1818_s17 = sand.u32 1, %s2336_s18  }
 0x305   : > { %p3703_p13 = scmp.ne.s32.totalorder %s3595_s6, 0  ;;  %s1819_s25 = scalar_lea.sflag [#allocation4], %s1818_s17 }
 0x307   : > { %p2058_p1 = pnand %p2062_p9, %p3703_p13 }
 0x309   : > { %2331 = dma.done.wait (!%p2058_p1), %s1819_s25, 32  }
 0x30a   : > { %2333 = vsyncadd (!%p2058_p1), %s1819_s25, 4294967264  ;;  %p18_p3 = scmp.ge.s32.totalorder %s2410_s24, 6   ;;  %s3704_s18 = smov %s2340_s19 }
 0x30b   : > { %s3705_s19 = smov %s2344_s20  ;;  %s3706_s20 = smov %s2422_s27 }
 0x30c   : > { %s3707_s21 = smov %s2410_s24  ;;  %20 = sbr.rel (!%p18_p3) target bundleno = 5 (0x5), region = 88 }
 0x313   :  { %1824 = vsyncpa [#allocation3], 1 }
 0x314   :  { %1826 = vsyncpa [#allocation3 + $0x1], 1 }
 0x315   :  { %1827 = vsyncpa [#allocation4], 1 }
 0x316   :  { %1829 = vsyncpa [#allocation4 + $0x1], 1 }

</bundles_post_ra>
